<compile_context>
chip_gen: v7x
topology: tpu7x:2x2x1
jax: 0.10.0
libtpu: 0.0.40
codegen_flags: <defaults>
</compile_context>

<pallas_src>
import jax
import jax.numpy as jnp
from jax.experimental import pallas as pl
from jax.experimental.pallas import tpu as pltpu

DIN_TAG = 300
DIN_CF = 200
HIDDEN = 512
DOUT = 256
BN_EPS = 1e-5
MAX_TILE_B = 256          # batch tile; weights stay VMEM-resident across tiles


# ---------------------------------------------------------------------------
# Kernel: one grid step == one batch tile, BOTH branches computed in the body.
#   out = (relu( (x @ deq(w1q)) * sc1 + shift ) @ deq(w2q)) * sc2 + b2
# where sc* are per-output-channel int8 quant scales, `shift` folds Linear
# bias + BN running stats + BN beta, and deq() is an int8->bf16 VPU cast.
# Dropout(p=0.5) is identity at inference time.
# ---------------------------------------------------------------------------
def _cf_model_kernel(tag_ref, cf_ref,
                     w1t_ref, sc1t_ref, sht_ref, w2t_ref, sc2t_ref, b2t_ref,
                     w1c_ref, sc1c_ref, shc_ref, w2c_ref, sc2c_ref, b2c_ref,
                     otag_ref, ocf_ref):
    def branch(x_ref, w1_ref, sc1_ref, sh_ref, w2_ref, sc2_ref, b2_ref, o_ref):
        x = x_ref[...].astype(jnp.bfloat16)                 # bf16 cast in-kernel
        w1 = w1_ref[...].astype(jnp.bfloat16)               # int8 -> bf16 (VPU)
        h = jnp.dot(x, w1, preferred_element_type=jnp.float32)   # MXU, f32 acc
        h = jnp.maximum(h * sc1_ref[...] + sh_ref[...], 0.0)     # dequant+BN+bias+ReLU
        w2 = w2_ref[...].astype(jnp.bfloat16)               # int8 -> bf16 (VPU)
        out = jnp.dot(h.astype(jnp.bfloat16), w2,
                      preferred_element_type=jnp.float32)        # MXU, f32 acc
        o_ref[...] = (out * sc2_ref[...] + b2_ref[...]).astype(o_ref.dtype)

    branch(tag_ref, w1t_ref, sc1t_ref, sht_ref, w2t_ref, sc2t_ref, b2t_ref, otag_ref)
    branch(cf_ref, w1c_ref, sc1c_ref, shc_ref, w2c_ref, sc2c_ref, b2c_ref, ocf_ref)


def _fused_call(tag, cf, p):
    B = tag.shape[0]
    tile_b = B if B <= MAX_TILE_B else MAX_TILE_B
    grid = (pl.cdiv(B, tile_b),)

    # batch-tiled rows (pipelined) vs. constant-index weights (VMEM-resident,
    # DMA'd once because the block index never changes across grid steps).
    row_spec = lambda k: pl.BlockSpec((tile_b, k), lambda i: (i, 0))
    res_spec = lambda shape: pl.BlockSpec(shape, lambda i: (0, 0))

    flops = 2 * B * ((DIN_TAG + DIN_CF) * HIDDEN + 2 * HIDDEN * DOUT)
    bytes_accessed = (
        (DIN_TAG + DIN_CF) * HIDDEN + 2 * HIDDEN * DOUT        # int8 weights
        + 4 * (4 * HIDDEN + 4 * DOUT)                          # f32 scales/shifts/biases
        + 4 * B * (DIN_TAG + DIN_CF)                           # f32 inputs
        + 4 * 2 * B * DOUT)                                    # f32 outputs

    return pl.pallas_call(
        _cf_model_kernel,
        out_shape=(jax.ShapeDtypeStruct((B, DOUT), jnp.float32),
                   jax.ShapeDtypeStruct((B, DOUT), jnp.float32)),
        grid=grid,
        in_specs=[
            row_spec(DIN_TAG),               # tag  (f32, batch-tiled)
            row_spec(DIN_CF),                # cf   (f32, batch-tiled)
            res_spec((DIN_TAG, HIDDEN)),     # w1_tag   int8
            res_spec((1, HIDDEN)),           # sc1_tag  f32
            res_spec((1, HIDDEN)),           # shift_tag f32
            res_spec((HIDDEN, DOUT)),        # w2_tag   int8
            res_spec((1, DOUT)),             # sc2_tag  f32
            res_spec((1, DOUT)),             # b2_tag   f32
            res_spec((DIN_CF, HIDDEN)),      # w1_cf    int8
            res_spec((1, HIDDEN)),           # sc1_cf   f32
            res_spec((1, HIDDEN)),           # shift_cf f32
            res_spec((HIDDEN, DOUT)),        # w2_cf    int8
            res_spec((1, DOUT)),             # sc2_cf   f32
            res_spec((1, DOUT)),             # b2_cf    f32
        ],
        out_specs=(row_spec(DOUT), row_spec(DOUT)),
        compiler_params=pltpu.CompilerParams(
            dimension_semantics=("parallel",),   # batch axis -> 2 TCs on v7x
            vmem_limit_bytes=16 << 20,
        ),
        cost_estimate=pl.CostEstimate(
            flops=flops, transcendentals=0, bytes_accessed=bytes_accessed),
    )(tag, cf,
      p["w1_tag"], p["sc1_tag"], p["shift_tag"], p["w2_tag"], p["sc2_tag"], p["b2_tag"],
      p["w1_cf"], p["sc1_cf"], p["shift_cf"], p["w2_cf"], p["sc2_cf"], p["b2_cf"])


# ---------------------------------------------------------------------------
# Parameter construction / one-time packing.
# ---------------------------------------------------------------------------
def init_params(key):
    """Deterministic synthetic parameters matching CFModel.__init__ shapes."""
    def linear(key, fan_in, fan_out):
        k_w, k_b = jax.random.split(key)
        bound = 1.0 / jnp.sqrt(fan_in)
        w = jax.random.uniform(k_w, (fan_in, fan_out), jnp.float32, -bound, bound)
        b = jax.random.uniform(k_b, (fan_out,), jnp.float32, -bound, bound)
        return w, b

    keys = jax.random.split(key, 4)
    p = {}
    p["fc1_w"], p["fc1_b"] = linear(keys[0], DIN_TAG, HIDDEN)
    p["fc2_w"], p["fc2_b"] = linear(keys[1], HIDDEN, DOUT)
    p["bn1_gamma"] = jnp.ones((HIDDEN,), jnp.float32)
    p["bn1_beta"] = jnp.zeros((HIDDEN,), jnp.float32)
    p["bn1_mean"] = jnp.zeros((HIDDEN,), jnp.float32)
    p["bn1_var"] = jnp.ones((HIDDEN,), jnp.float32)
    p["cf_fc1_w"], p["cf_fc1_b"] = linear(keys[2], DIN_CF, HIDDEN)
    p["cf_fc2_w"], p["cf_fc2_b"] = linear(keys[3], HIDDEN, DOUT)
    p["cf_bn1_gamma"] = jnp.ones((HIDDEN,), jnp.float32)
    p["cf_bn1_beta"] = jnp.zeros((HIDDEN,), jnp.float32)
    p["cf_bn1_mean"] = jnp.zeros((HIDDEN,), jnp.float32)
    p["cf_bn1_var"] = jnp.ones((HIDDEN,), jnp.float32)
    return p


def _quantize_per_col(w):
    """Symmetric per-output-channel int8 quantization."""
    amax = jnp.max(jnp.abs(w), axis=0)
    scale = jnp.maximum(amax / 127.0, 1e-12)
    q = jnp.clip(jnp.round(w / scale[None, :]), -127.0, 127.0).astype(jnp.int8)
    return q, scale.astype(jnp.float32)


def pack_params(p, eps=BN_EPS):
    """One-time (hoisted out of forward): fold BN + bias, quantize weights to
    int8 with per-output-channel scales.  No input-dim padding, no stacking."""
    def fold(w1, b1, gamma, beta, mean, var, w2, b2):
        inv_std = gamma / jnp.sqrt(var + eps)                 # (H,)
        w1_eff = w1 * inv_std[None, :]                        # BN scale into columns
        shift = (b1 - mean) * inv_std + beta                  # (H,)
        w1_q, sc1 = _quantize_per_col(w1_eff)
        w2_q, sc2 = _quantize_per_col(w2)
        return (w1_q, sc1.reshape(1, HIDDEN), shift.reshape(1, HIDDEN),
                w2_q, sc2.reshape(1, DOUT), b2.reshape(1, DOUT))

    w1t, sc1t, sht, w2t, sc2t, b2t = fold(p["fc1_w"], p["fc1_b"], p["bn1_gamma"],
                                          p["bn1_beta"], p["bn1_mean"], p["bn1_var"],
                                          p["fc2_w"], p["fc2_b"])
    w1c, sc1c, shc, w2c, sc2c, b2c = fold(p["cf_fc1_w"], p["cf_fc1_b"],
                                          p["cf_bn1_gamma"], p["cf_bn1_beta"],
                                          p["cf_bn1_mean"], p["cf_bn1_var"],
                                          p["cf_fc2_w"], p["cf_fc2_b"])
    return {
        "w1_tag": w1t, "sc1_tag": sc1t, "shift_tag": sht,
        "w2_tag": w2t, "sc2_tag": sc2t, "b2_tag": b2t,
        "w1_cf": w1c, "sc1_cf": sc1c, "shift_cf": shc,
        "w2_cf": w2c, "sc2_cf": sc2c, "b2_cf": b2c,
    }


# ---------------------------------------------------------------------------
# Forward (eval-mode semantics of CFModel.forward).
# ---------------------------------------------------------------------------
@jax.jit
def cf_model_forward(packed, tag, spec, cf):
    del spec  # unused, mirroring the PyTorch forward
    tag_emb, song_emb = _fused_call(tag, cf, packed)
    return tag_emb, song_emb


# ---------------------------------------------------------------------------
# Pure-JAX f32 reference (eval-mode PyTorch semantics) for the correctness check.
# ---------------------------------------------------------------------------
def _reference_forward(params, tag, cf, eps=BN_EPS):
    def branch(x, w1, b1, g, bta, m, v, w2, b2):
        h = x @ w1 + b1
        h = (h - m) / jnp.sqrt(v + eps) * g + bta
        h = jnp.maximum(h, 0.0)
        return h @ w2 + b2
    t = branch(tag, params["fc1_w"], params["fc1_b"], params["bn1_gamma"],
               params["bn1_beta"], params["bn1_mean"], params["bn1_var"],
               params["fc2_w"], params["fc2_b"])
    s = branch(cf, params["cf_fc1_w"], params["cf_fc1_b"], params["cf_bn1_gamma"],
               params["cf_bn1_beta"], params["cf_bn1_mean"], params["cf_bn1_var"],
               params["cf_fc2_w"], params["cf_fc2_b"])
    return t, s


if __name__ == "__main__":
    key = jax.random.PRNGKey(0)
    k_params, k_tag, k_spec, k_cf = jax.random.split(key, 4)

    params = init_params(k_params)
    packed = pack_params(params)   # hoisted: BN fold / int8 quant (no padding, no stack)

    B = 8
    tag = jax.random.normal(k_tag, (B, DIN_TAG), jnp.float32)
    spec = jax.random.normal(k_spec, (B, 8, 16), jnp.float32)   # unused, as in PyTorch
    cf = jax.random.normal(k_cf, (B, DIN_CF), jnp.float32)

    tag_emb, song_emb = cf_model_forward(packed, tag, spec, cf)
    jax.block_until_ready((tag_emb, song_emb))

    # correctness check against pure-JAX f32 reference
    # (tolerance loosened: bf16 MXU operands + int8 per-channel weight quant)
    ref_tag, ref_song = _reference_forward(params, tag, cf)
    assert tag_emb.shape == (B, DOUT) and song_emb.shape == (B, DOUT)
    assert jnp.allclose(tag_emb, ref_tag, atol=5e-2, rtol=5e-2)
    assert jnp.allclose(song_emb, ref_song, atol=5e-2, rtol=5e-2)

    # TODO(synk): training-mode BatchNorm (batch statistics) and Dropout sampling
    # are not implemented; this kernel reproduces eval-mode semantics only.

    print("KERNEL_OK")
</pallas_src>

<mosaic_0001>
module attributes {stable_mosaic.version = 11 : i64} {
  func.func @_cf_model_kernel(%arg0: i32, %arg1: memref<8x300xf32, #tpu.memory_space<vmem>>, %arg2: memref<8x200xf32, #tpu.memory_space<vmem>>, %arg3: memref<300x512xi8, #tpu.memory_space<vmem>>, %arg4: memref<1x512xf32, #tpu.memory_space<vmem>>, %arg5: memref<1x512xf32, #tpu.memory_space<vmem>>, %arg6: memref<512x256xi8, #tpu.memory_space<vmem>>, %arg7: memref<1x256xf32, #tpu.memory_space<vmem>>, %arg8: memref<1x256xf32, #tpu.memory_space<vmem>>, %arg9: memref<200x512xi8, #tpu.memory_space<vmem>>, %arg10: memref<1x512xf32, #tpu.memory_space<vmem>>, %arg11: memref<1x512xf32, #tpu.memory_space<vmem>>, %arg12: memref<512x256xi8, #tpu.memory_space<vmem>>, %arg13: memref<1x256xf32, #tpu.memory_space<vmem>>, %arg14: memref<1x256xf32, #tpu.memory_space<vmem>>, %arg15: memref<8x256xf32, #tpu.memory_space<vmem>>, %arg16: memref<8x256xf32, #tpu.memory_space<vmem>>) attributes {dimension_semantics = [#tpu.dimension_semantics<parallel>], iteration_bounds = array<i64: 1>, scalar_prefetch = 0 : i64, scratch_operands = 0 : i64, tpu.core_type = #tpu.core_type<tc>, window_params = [{transform_indices = @transform_0, window_bounds = array<i64: 8, 300>}, {transform_indices = @transform_1, window_bounds = array<i64: 8, 200>}, {pipeline_mode = #tpu.pipeline_mode<synchronous>, transform_indices = @transform_2, window_bounds = array<i64: 300, 512>}, {pipeline_mode = #tpu.pipeline_mode<synchronous>, transform_indices = @transform_3, window_bounds = array<i64: 1, 512>}, {pipeline_mode = #tpu.pipeline_mode<synchronous>, transform_indices = @transform_4, window_bounds = array<i64: 1, 512>}, {pipeline_mode = #tpu.pipeline_mode<synchronous>, transform_indices = @transform_5, window_bounds = array<i64: 512, 256>}, {pipeline_mode = #tpu.pipeline_mode<synchronous>, transform_indices = @transform_6, window_bounds = array<i64: 1, 256>}, {pipeline_mode = #tpu.pipeline_mode<synchronous>, transform_indices = @transform_7, window_bounds = array<i64: 1, 256>}, {pipeline_mode = #tpu.pipeline_mode<synchronous>, transform_indices = @transform_8, window_bounds = array<i64: 200, 512>}, {pipeline_mode = #tpu.pipeline_mode<synchronous>, transform_indices = @transform_9, window_bounds = array<i64: 1, 512>}, {pipeline_mode = #tpu.pipeline_mode<synchronous>, transform_indices = @transform_10, window_bounds = array<i64: 1, 512>}, {pipeline_mode = #tpu.pipeline_mode<synchronous>, transform_indices = @transform_11, window_bounds = array<i64: 512, 256>}, {pipeline_mode = #tpu.pipeline_mode<synchronous>, transform_indices = @transform_12, window_bounds = array<i64: 1, 256>}, {pipeline_mode = #tpu.pipeline_mode<synchronous>, transform_indices = @transform_13, window_bounds = array<i64: 1, 256>}, {transform_indices = @transform_14, window_bounds = array<i64: 8, 256>}, {transform_indices = @transform_15, window_bounds = array<i64: 8, 256>}]} {
    %c0 = arith.constant 0 : index
    %c0_0 = arith.constant 0 : index
    %0 = vector.load %arg1[%c0, %c0_0] : memref<8x300xf32, #tpu.memory_space<vmem>>, vector<8x300xf32>
    %1 = arith.truncf %0 : vector<8x300xf32> to vector<8x300xbf16>
    %c0_1 = arith.constant 0 : index
    %c0_2 = arith.constant 0 : index
    %2 = vector.load %arg3[%c0_1, %c0_2] : memref<300x512xi8, #tpu.memory_space<vmem>>, vector<300x512xi8>
    %3 = arith.sitofp %2 : vector<300x512xi8> to vector<300x512xbf16>
    %cst = arith.constant dense<0.000000e+00> : vector<8x512xf32>
    %4 = tpu.matmul %1, %3, %cst {dimension_numbers = #tpu.dot_dimension_numbers<[1], [0], [0], [1], [0, 0, 1, 1], [], []>} : vector<8x300xbf16>, vector<300x512xbf16>, vector<8x512xf32> -> vector<8x512xf32>
    %c0_3 = arith.constant 0 : index
    %c0_4 = arith.constant 0 : index
    %5 = vector.load %arg4[%c0_3, %c0_4] : memref<1x512xf32, #tpu.memory_space<vmem>>, vector<1x512xf32>
    %6 = vector.broadcast %5 : vector<1x512xf32> to vector<8x512xf32>
    %7 = arith.mulf %4, %6 : vector<8x512xf32>
    %c0_5 = arith.constant 0 : index
    %c0_6 = arith.constant 0 : index
    %8 = vector.load %arg5[%c0_5, %c0_6] : memref<1x512xf32, #tpu.memory_space<vmem>>, vector<1x512xf32>
    %9 = vector.broadcast %8 : vector<1x512xf32> to vector<8x512xf32>
    %10 = arith.addf %7, %9 : vector<8x512xf32>
    %cst_7 = arith.constant 0.000000e+00 : f32
    %11 = vector.broadcast %cst_7 : f32 to vector<8x512xf32>
    %12 = arith.maximumf %10, %11 : vector<8x512xf32>
    %c0_8 = arith.constant 0 : index
    %c0_9 = arith.constant 0 : index
    %13 = vector.load %arg6[%c0_8, %c0_9] : memref<512x256xi8, #tpu.memory_space<vmem>>, vector<512x256xi8>
    %14 = arith.sitofp %13 : vector<512x256xi8> to vector<512x256xbf16>
    %15 = arith.truncf %12 : vector<8x512xf32> to vector<8x512xbf16>
    %cst_10 = arith.constant dense<0.000000e+00> : vector<8x256xf32>
    %16 = tpu.matmul %15, %14, %cst_10 {dimension_numbers = #tpu.dot_dimension_numbers<[1], [0], [0], [1], [0, 0, 1, 1], [], []>} : vector<8x512xbf16>, vector<512x256xbf16>, vector<8x256xf32> -> vector<8x256xf32>
    %c0_11 = arith.constant 0 : index
    %c0_12 = arith.constant 0 : index
    %17 = vector.load %arg7[%c0_11, %c0_12] : memref<1x256xf32, #tpu.memory_space<vmem>>, vector<1x256xf32>
    %18 = vector.broadcast %17 : vector<1x256xf32> to vector<8x256xf32>
    %19 = arith.mulf %16, %18 : vector<8x256xf32>
    %c0_13 = arith.constant 0 : index
    %c0_14 = arith.constant 0 : index
    %20 = vector.load %arg8[%c0_13, %c0_14] : memref<1x256xf32, #tpu.memory_space<vmem>>, vector<1x256xf32>
    %21 = vector.broadcast %20 : vector<1x256xf32> to vector<8x256xf32>
    %22 = arith.addf %19, %21 : vector<8x256xf32>
    %c0_15 = arith.constant 0 : index
    %c0_16 = arith.constant 0 : index
    %23 = vector.load %arg15[%c0_15, %c0_16] : memref<8x256xf32, #tpu.memory_space<vmem>>, vector<8x256xf32>
    tpu.vector_store %arg15[%c0_15, %c0_16], %22 {strides = array<i32>} : memref<8x256xf32, #tpu.memory_space<vmem>>, vector<8x256xf32>,
    %c0_17 = arith.constant 0 : index
    %c0_18 = arith.constant 0 : index
    %24 = vector.load %arg2[%c0_17, %c0_18] : memref<8x200xf32, #tpu.memory_space<vmem>>, vector<8x200xf32>
    %25 = arith.truncf %24 : vector<8x200xf32> to vector<8x200xbf16>
    %c0_19 = arith.constant 0 : index
    %c0_20 = arith.constant 0 : index
    %26 = vector.load %arg9[%c0_19, %c0_20] : memref<200x512xi8, #tpu.memory_space<vmem>>, vector<200x512xi8>
    %27 = arith.sitofp %26 : vector<200x512xi8> to vector<200x512xbf16>
    %cst_21 = arith.constant dense<0.000000e+00> : vector<8x512xf32>
    %28 = tpu.matmul %25, %27, %cst_21 {dimension_numbers = #tpu.dot_dimension_numbers<[1], [0], [0], [1], [0, 0, 1, 1], [], []>} : vector<8x200xbf16>, vector<200x512xbf16>, vector<8x512xf32> -> vector<8x512xf32>
    %c0_22 = arith.constant 0 : index
    %c0_23 = arith.constant 0 : index
    %29 = vector.load %arg10[%c0_22, %c0_23] : memref<1x512xf32, #tpu.memory_space<vmem>>, vector<1x512xf32>
    %30 = vector.broadcast %29 : vector<1x512xf32> to vector<8x512xf32>
    %31 = arith.mulf %28, %30 : vector<8x512xf32>
    %c0_24 = arith.constant 0 : index
    %c0_25 = arith.constant 0 : index
    %32 = vector.load %arg11[%c0_24, %c0_25] : memref<1x512xf32, #tpu.memory_space<vmem>>, vector<1x512xf32>
    %33 = vector.broadcast %32 : vector<1x512xf32> to vector<8x512xf32>
    %34 = arith.addf %31, %33 : vector<8x512xf32>
    %cst_26 = arith.constant 0.000000e+00 : f32
    %35 = vector.broadcast %cst_26 : f32 to vector<8x512xf32>
    %36 = arith.maximumf %34, %35 : vector<8x512xf32>
    %c0_27 = arith.constant 0 : index
    %c0_28 = arith.constant 0 : index
    %37 = vector.load %arg12[%c0_27, %c0_28] : memref<512x256xi8, #tpu.memory_space<vmem>>, vector<512x256xi8>
    %38 = arith.sitofp %37 : vector<512x256xi8> to vector<512x256xbf16>
    %39 = arith.truncf %36 : vector<8x512xf32> to vector<8x512xbf16>
    %cst_29 = arith.constant dense<0.000000e+00> : vector<8x256xf32>
    %40 = tpu.matmul %39, %38, %cst_29 {dimension_numbers = #tpu.dot_dimension_numbers<[1], [0], [0], [1], [0, 0, 1, 1], [], []>} : vector<8x512xbf16>, vector<512x256xbf16>, vector<8x256xf32> -> vector<8x256xf32>
    %c0_30 = arith.constant 0 : index
    %c0_31 = arith.constant 0 : index
    %41 = vector.load %arg13[%c0_30, %c0_31] : memref<1x256xf32, #tpu.memory_space<vmem>>, vector<1x256xf32>
    %42 = vector.broadcast %41 : vector<1x256xf32> to vector<8x256xf32>
    %43 = arith.mulf %40, %42 : vector<8x256xf32>
    %c0_32 = arith.constant 0 : index
    %c0_33 = arith.constant 0 : index
    %44 = vector.load %arg14[%c0_32, %c0_33] : memref<1x256xf32, #tpu.memory_space<vmem>>, vector<1x256xf32>
    %45 = vector.broadcast %44 : vector<1x256xf32> to vector<8x256xf32>
    %46 = arith.addf %43, %45 : vector<8x256xf32>
    %c0_34 = arith.constant 0 : index
    %c0_35 = arith.constant 0 : index
    %47 = vector.load %arg16[%c0_34, %c0_35] : memref<8x256xf32, #tpu.memory_space<vmem>>, vector<8x256xf32>
    tpu.vector_store %arg16[%c0_34, %c0_35], %46 {strides = array<i32>} : memref<8x256xf32, #tpu.memory_space<vmem>>, vector<8x256xf32>,
    return
  }
  func.func @transform_0(%arg0: i32) -> (i32, i32) {
    %c0_i32 = arith.constant 0 : i32
    %c0_i32_0 = arith.constant 0 : i32
    return %arg0, %c0_i32 : i32, i32
  }
  func.func @transform_1(%arg0: i32) -> (i32, i32) {
    %c0_i32 = arith.constant 0 : i32
    %c0_i32_0 = arith.constant 0 : i32
    return %arg0, %c0_i32 : i32, i32
  }
  func.func @transform_2(%arg0: i32) -> (i32, i32) {
    %c0_i32 = arith.constant 0 : i32
    %c0_i32_0 = arith.constant 0 : i32
    %c0_i32_1 = arith.constant 0 : i32
    return %c0_i32, %c0_i32_0 : i32, i32
  }
  func.func @transform_3(%arg0: i32) -> (i32, i32) {
    %c0_i32 = arith.constant 0 : i32
    %c0_i32_0 = arith.constant 0 : i32
    %c0_i32_1 = arith.constant 0 : i32
    return %c0_i32, %c0_i32_0 : i32, i32
  }
  func.func @transform_4(%arg0: i32) -> (i32, i32) {
    %c0_i32 = arith.constant 0 : i32
    %c0_i32_0 = arith.constant 0 : i32
    %c0_i32_1 = arith.constant 0 : i32
    return %c0_i32, %c0_i32_0 : i32, i32
  }
  func.func @transform_5(%arg0: i32) -> (i32, i32) {
    %c0_i32 = arith.constant 0 : i32
    %c0_i32_0 = arith.constant 0 : i32
    %c0_i32_1 = arith.constant 0 : i32
    return %c0_i32, %c0_i32_0 : i32, i32
  }
  func.func @transform_6(%arg0: i32) -> (i32, i32) {
    %c0_i32 = arith.constant 0 : i32
    %c0_i32_0 = arith.constant 0 : i32
    %c0_i32_1 = arith.constant 0 : i32
    return %c0_i32, %c0_i32_0 : i32, i32
  }
  func.func @transform_7(%arg0: i32) -> (i32, i32) {
    %c0_i32 = arith.constant 0 : i32
    %c0_i32_0 = arith.constant 0 : i32
    %c0_i32_1 = arith.constant 0 : i32
    return %c0_i32, %c0_i32_0 : i32, i32
  }
  func.func @transform_8(%arg0: i32) -> (i32, i32) {
    %c0_i32 = arith.constant 0 : i32
    %c0_i32_0 = arith.constant 0 : i32
    %c0_i32_1 = arith.constant 0 : i32
    return %c0_i32, %c0_i32_0 : i32, i32
  }
  func.func @transform_9(%arg0: i32) -> (i32, i32) {
    %c0_i32 = arith.constant 0 : i32
    %c0_i32_0 = arith.constant 0 : i32
    %c0_i32_1 = arith.constant 0 : i32
    return %c0_i32, %c0_i32_0 : i32, i32
  }
  func.func @transform_10(%arg0: i32) -> (i32, i32) {
    %c0_i32 = arith.constant 0 : i32
    %c0_i32_0 = arith.constant 0 : i32
    %c0_i32_1 = arith.constant 0 : i32
    return %c0_i32, %c0_i32_0 : i32, i32
  }
  func.func @transform_11(%arg0: i32) -> (i32, i32) {
    %c0_i32 = arith.constant 0 : i32
    %c0_i32_0 = arith.constant 0 : i32
    %c0_i32_1 = arith.constant 0 : i32
    return %c0_i32, %c0_i32_0 : i32, i32
  }
  func.func @transform_12(%arg0: i32) -> (i32, i32) {
    %c0_i32 = arith.constant 0 : i32
    %c0_i32_0 = arith.constant 0 : i32
    %c0_i32_1 = arith.constant 0 : i32
    return %c0_i32, %c0_i32_0 : i32, i32
  }
  func.func @transform_13(%arg0: i32) -> (i32, i32) {
    %c0_i32 = arith.constant 0 : i32
    %c0_i32_0 = arith.constant 0 : i32
    %c0_i32_1 = arith.constant 0 : i32
    return %c0_i32, %c0_i32_0 : i32, i32
  }
  func.func @transform_14(%arg0: i32) -> (i32, i32) {
    %c0_i32 = arith.constant 0 : i32
    %c0_i32_0 = arith.constant 0 : i32
    return %arg0, %c0_i32 : i32, i32
  }
  func.func @transform_15(%arg0: i32) -> (i32, i32) {
    %c0_i32 = arith.constant 0 : i32
    %c0_i32_0 = arith.constant 0 : i32
    return %arg0, %c0_i32 : i32, i32
  }
}

</mosaic_0001>

<bundles_post_ra>
// kernel: cf_model_forward.1
= control target key start
LH: loop header
LB: loop body
LE: loop exit
PB: predicated region body
PF: predicated region fallthrough
CT: control target
= control target key end

     0   :  { %21 = vsyncpa [#allocation3], 0  ;;  %s3003_s0 = inlined_call_operand.vmem [shape: f32[8,300], index: 0, kind: input, shape index: {}]   ;;  %s3004_s1 = inlined_call_operand.vmem [shape: f32[8,200], index: 1, kind: input, shape index: {}]   ;;  %s3005_s2 = inlined_call_operand.hbm [shape: s8[300,512], index: 2, kind: input, shape index: {}]   ;;  %s3006_s3 = inlined_call_operand.vmem [shape: f32[1,512], index: 3, kind: input, shape index: {}]   ;;  %s3007_s4 = inlined_call_operand.hbm [shape: f32[1,512], index: 4, kind: input, shape index: {}]   ;;  %s3008_s5 = inlined_call_operand.hbm [shape: s8[512,256], index: 5, kind: input, shape index: {}]   ;;  %s3009_s6 = inlined_call_operand.hbm [shape: f32[1,256], index: 6, kind: input, shape index: {}]   ;;  %s3010_s7 = inlined_call_operand.hbm [shape: f32[1,256], index: 7, kind: input, shape index: {}]   ;;  %s3011_s8 = inlined_call_operand.hbm [shape: s8[200,512], index: 8, kind: input, shape index: {}]   ;;  %s3012_s9 = inlined_call_operand.hbm [shape: f32[1,512], index: 9, kind: input, shape index: {}]   ;;  %s3013_s10 = inlined_call_operand.hbm [shape: f32[1,512], index: 10, kind: input, shape index: {}]   ;;  %s3014_s11 = inlined_call_operand.hbm [shape: s8[512,256], index: 11, kind: input, shape index: {}]   ;;  %s3015_s12 = inlined_call_operand.hbm [shape: f32[1,256], index: 12, kind: input, shape index: {}]   ;;  %s3016_s13 = inlined_call_operand.hbm [shape: f32[1,256], index: 13, kind: input, shape index: {}]   ;;  %s3017_s14 = inlined_call_operand.hbm [shape: f32[8,256], index: 14, kind: output, shape index: {0}]   ;;  %s3018_s15 = inlined_call_operand.hbm [shape: f32[8,256], index: 15, kind: output, shape index: {1}]  }
   0x1   :  { %22 = vsyncpa [#allocation6], 0 }
   0x2   :  { %23 = vsyncpa [#allocation9], 0 }
   0x3   :  { %24 = vsyncpa [#allocation12], 0 }
   0x4   :  { %25 = vsyncpa [#allocation15], 0 }
   0x5   :  { %26 = vsyncpa [#allocation18], 0 }
   0x6   :  { %27 = vsyncpa [#allocation4], 0 }
   0x7   :  { %28 = vsyncpa [#allocation22], 0  ;;  %s2334_s18 = smov [#allocation5]   ;;  %s2335_s20 = smov [#allocation8]  }
   0x8   :  { %s53_s19 = sshll.u32 %s2334_s18, 4  ;;  %s75_s21 = sshll.u32 %s2335_s20, 4  ;;  %s54_s19 = int_to_ptr.vmem [resolvable:$true] %s53_s19  ;;  %s76_s21 = int_to_ptr.vmem [resolvable:$true] %s75_s21 }
   0x9   :  { %s2032_s24 = scalar_lea.hbm %s3007_s4, 64 }
   0xa   :  { %p2033_p0 = scmp.ne.s32.totalorder %s3007_s4, %s2032_s24  ;;  %p2036_p1 = scmp.lt.u32.totalorder %s2032_s24, %s3007_s4 }
   0xc   :  { %p2038_p2 = pnand %p2036_p1, %p2033_p0 }
   0xe   :  { %2041 = shalt.err (!%p2038_p2)
}
   0xf   :  { %s2042_s29 = scalar_lea.vmem %s54_s19, 64  ;;  %p2047_p4 = scmp.lt.s32.totalorder %s54_s19, %s54_s19 }
  0x10   :  { %p2043_p3 = scmp.ne.s32.totalorder %s54_s19, %s2042_s29  ;;  %p2048_p5 = scmp.lt.s32.totalorder %s2042_s29, %s2042_s29 }
  0x12   :  { %p2049_p6 = por %p2048_p5, %p2047_p4 }
  0x14   :  { %p2050_p7 = pnand %p2049_p6, %p2043_p3 }
  0x16   :  { %2053 = shalt.err (!%p2050_p7)
}
  0x17   :  { %56 = dma.hbm_to_vmem [thread:$0]  %s3007_s4, 64, %s54_s19, [#allocation6]  }
  0x18   :  { %s2054_s20 = scalar_lea.hbm %s3009_s6, 32 }
  0x19   :  { %p2055_p8 = scmp.ne.s32.totalorder %s3009_s6, %s2054_s20  ;;  %p2058_p9 = scmp.lt.u32.totalorder %s2054_s20, %s3009_s6 }
  0x1b   :  { %p2060_p10 = pnand %p2058_p9, %p2055_p8 }
  0x1d   :  { %2063 = shalt.err (!%p2060_p10)
}
  0x1e   :  { %s2064_s26 = scalar_lea.vmem %s76_s21, 32  ;;  %p2069_p12 = scmp.lt.s32.totalorder %s76_s21, %s76_s21 }
  0x1f   :  { %p2065_p11 = scmp.ne.s32.totalorder %s76_s21, %s2064_s26  ;;  %p2070_p13 = scmp.lt.s32.totalorder %s2064_s26, %s2064_s26 }
  0x21   :  { %p2071_p0 = por %p2070_p13, %p2069_p12 }
  0x23   :  { %p2072_p1 = pnand %p2071_p0, %p2065_p11 }
  0x25   :  { %2075 = shalt.err (!%p2072_p1)
}
  0x26   :  { %78 = dma.hbm_to_vmem [thread:$0]  %s3009_s6, 32, %s76_s21, [#allocation9]  }
  0x27   :  { %s2336_s27 = smov [#allocation11]   ;;  %s2337_s29 = smov [#allocation14]  }
  0x28   :  { %s94_s28 = sshll.u32 %s2336_s27, 4  ;;  %s117_s30 = sshll.u32 %s2337_s29, 4  ;;  %s95_s28 = int_to_ptr.vmem [resolvable:$true] %s94_s28  ;;  %s118_s30 = int_to_ptr.vmem [resolvable:$true] %s117_s30 }
  0x29   :  { %s2076_s18 = scalar_lea.hbm %s3011_s8, 3200 }
  0x2a   :  { %p2077_p2 = scmp.ne.s32.totalorder %s3011_s8, %s2076_s18  ;;  %p2080_p3 = scmp.lt.u32.totalorder %s2076_s18, %s3011_s8 }
  0x2c   :  { %p2082_p4 = pnand %p2080_p3, %p2077_p2 }
  0x2e   :  { %2085 = shalt.err (!%p2082_p4)
}
  0x2f   :  { %s2086_s6 = scalar_lea.vmem %s95_s28, 3200  ;;  %p2091_p6 = scmp.lt.s32.totalorder %s95_s28, %s95_s28 }
  0x30   :  { %p2087_p5 = scmp.ne.s32.totalorder %s95_s28, %s2086_s6  ;;  %p2092_p7 = scmp.lt.s32.totalorder %s2086_s6, %s2086_s6 }
  0x32   :  { %p2093_p8 = por %p2092_p7, %p2091_p6 }
  0x34   :  { %p2094_p9 = pnand %p2093_p8, %p2087_p5 }
  0x36   :  { %2097 = shalt.err (!%p2094_p9)
}
  0x37   :  { %s2338_s21 = smov 128   ;;  %s2339_s25 = smov 8  }
  0x38   :  { %100 = dma.hbm_to_vmem [thread:$0]  %s3011_s8, 3200, %s95_s28, [#allocation12], %s2338_s21, %s2338_s21, %s2339_s25  }
  0x39   :  { %s2098_s29 = scalar_lea.hbm %s3013_s10, 64 }
  0x3a   :  { %p2099_p10 = scmp.ne.s32.totalorder %s3013_s10, %s2098_s29  ;;  %p2102_p11 = scmp.lt.u32.totalorder %s2098_s29, %s3013_s10 }
  0x3c   :  { %p2104_p12 = pnand %p2102_p11, %p2099_p10 }
  0x3e   :  { %2107 = shalt.err (!%p2104_p12)
}
  0x3f   :  { %s2108_s22 = scalar_lea.vmem %s118_s30, 64  ;;  %p2113_p0 = scmp.lt.s32.totalorder %s118_s30, %s118_s30 }
  0x40   :  { %p2109_p13 = scmp.ne.s32.totalorder %s118_s30, %s2108_s22  ;;  %p2114_p1 = scmp.lt.s32.totalorder %s2108_s22, %s2108_s22 }
  0x42   :  { %p2115_p2 = por %p2114_p1, %p2113_p0 }
  0x44   :  { %p2116_p3 = pnand %p2115_p2, %p2109_p13 }
  0x46   :  { %2119 = shalt.err (!%p2116_p3)
}
  0x47   :  { %120 = dma.hbm_to_vmem [thread:$0]  %s3013_s10, 64, %s118_s30, [#allocation15]  }
  0x48   :  { %s2340_s23 = smov [#allocation17]   ;;  %s2341_s6 = smov [#allocation2]  }
  0x49   :  { %s139_s24 = sshll.u32 %s2340_s23, 4  ;;  %s38_s26 = sshll.u32 %s2341_s6, 4  ;;  %s140_s24 = int_to_ptr.vmem [resolvable:$true] %s139_s24  ;;  %s2483_s26 = int_to_ptr.vmem [resolvable:$true] %s38_s26 }
  0x4a   :  { %s2120_s27 = scalar_lea.hbm %s3015_s12, 32 }
  0x4b   :  { %p2121_p4 = scmp.ne.s32.totalorder %s3015_s12, %s2120_s27  ;;  %p2124_p5 = scmp.lt.u32.totalorder %s2120_s27, %s3015_s12 }
  0x4d   :  { %p2126_p6 = pnand %p2124_p5, %p2121_p4 }
  0x4f   :  { %2129 = shalt.err (!%p2126_p6)
}
  0x50   :  { %s2130_s10 = scalar_lea.vmem %s140_s24, 32  ;;  %p2135_p8 = scmp.lt.s32.totalorder %s140_s24, %s140_s24 }
  0x51   :  { %p2131_p7 = scmp.ne.s32.totalorder %s140_s24, %s2130_s10  ;;  %p2136_p9 = scmp.lt.s32.totalorder %s2130_s10, %s2130_s10 }
  0x53   :  { %p2137_p10 = por %p2136_p9, %p2135_p8 }
  0x55   :  { %p2138_p11 = pnand %p2137_p10, %p2131_p7 }
  0x57   :  { %2141 = shalt.err (!%p2138_p11)
}
  0x58   :  { %142 = dma.hbm_to_vmem [thread:$0]  %s3015_s12, 32, %s140_s24, [#allocation18]  }
  0x59   :  { %s2142_s28 = scalar_lea.hbm %s3005_s2, 4864 }
  0x5a   :  { %p2143_p12 = scmp.ne.s32.totalorder %s3005_s2, %s2142_s28  ;;  %p2146_p13 = scmp.lt.u32.totalorder %s2142_s28, %s3005_s2 }
  0x5c   :  { %p2148_p0 = pnand %p2146_p13, %p2143_p12 }
  0x5e   :  { %2151 = shalt.err (!%p2148_p0)
}
  0x5f   :  { %s2152_s27 = scalar_lea.vmem %s2483_s26, 4864  ;;  %p2157_p2 = scmp.lt.s32.totalorder %s2483_s26, %s2483_s26 }
  0x60   :  { %p2153_p1 = scmp.ne.s32.totalorder %s2483_s26, %s2152_s27  ;;  %p2158_p3 = scmp.lt.s32.totalorder %s2152_s27, %s2152_s27 }
  0x62   :  { %p2159_p4 = por %p2158_p3, %p2157_p2 }
  0x64   :  { %p2160_p5 = pnand %p2159_p4, %p2153_p1 }
  0x66   :  { %2163 = shalt.err (!%p2160_p5)
}
  0x67   :  { %44 = dma.hbm_to_vmem [thread:$0]  %s3005_s2, 4864, %s2483_s26, [#allocation3], %s2338_s21, %s2338_s21, %s2339_s25  }
  0x68   :  { %s2342_s29 = smov [#allocation7]   ;;  %s2164_s10 = scalar_lea.hbm %s3008_s5, 4096 }
  0x69   :  { %s62_s16 = sshll.u32 %s2342_s29, 4  ;;  %p2165_p6 = scmp.ne.s32.totalorder %s3008_s5, %s2164_s10  ;;  %s63_s16 = int_to_ptr.vmem [resolvable:$true] %s62_s16 }
  0x6a   :  { %p2168_p7 = scmp.lt.u32.totalorder %s2164_s10, %s3008_s5 }
  0x6c   :  { %p2170_p8 = pnand %p2168_p7, %p2165_p6 }
  0x6e   :  { %2173 = shalt.err (!%p2170_p8)
}
  0x6f   :  { %s2174_s28 = scalar_lea.vmem %s63_s16, 4096  ;;  %p2179_p10 = scmp.lt.s32.totalorder %s63_s16, %s63_s16 }
  0x70   :  { %p2175_p9 = scmp.ne.s32.totalorder %s63_s16, %s2174_s28  ;;  %p2180_p11 = scmp.lt.s32.totalorder %s2174_s28, %s2174_s28 }
  0x72   :  { %p2181_p12 = por %p2180_p11, %p2179_p10 }
  0x74   :  { %p2182_p13 = pnand %p2181_p12, %p2175_p9 }
  0x76   :  { %2185 = shalt.err (!%p2182_p13)
}
  0x77   :  { %s2343_s2 = smov 256   ;;  %s2344_s21 = smov 16  }
  0x78   :  { %68 = dma.hbm_to_vmem [thread:$0]  %s3008_s5, 4096, %s63_s16, [#allocation6], %s2343_s2, %s2343_s2, %s2344_s21  }
  0x79   :  { %s2345_s23 = smov [#allocation10]   ;;  %s2346_s4 = smov [#allocation13]  }
  0x7a   :  { %s85_s6 = sshll.u32 %s2345_s23, 4  ;;  %s107_s19 = sshll.u32 %s2346_s4, 4  ;;  %s86_s6 = int_to_ptr.vmem [resolvable:$true] %s85_s6  ;;  %s108_s19 = int_to_ptr.vmem [resolvable:$true] %s107_s19 }
  0x7b   :  { %s2186_s24 = scalar_lea.hbm %s3010_s7, 32 }
  0x7c   :  { %p2187_p0 = scmp.ne.s32.totalorder %s3010_s7, %s2186_s24  ;;  %p2190_p1 = scmp.lt.u32.totalorder %s2186_s24, %s3010_s7 }
  0x7e   :  { %p2192_p2 = pnand %p2190_p1, %p2187_p0 }
  0x80   :  { %2195 = shalt.err (!%p2192_p2)
}
  0x81   :  { %s2196_s5 = scalar_lea.vmem %s86_s6, 32  ;;  %p2201_p4 = scmp.lt.s32.totalorder %s86_s6, %s86_s6 }
  0x82   :  { %p2197_p3 = scmp.ne.s32.totalorder %s86_s6, %s2196_s5  ;;  %p2202_p5 = scmp.lt.s32.totalorder %s2196_s5, %s2196_s5 }
  0x84   :  { %p2203_p6 = por %p2202_p5, %p2201_p4 }
  0x86   :  { %p2204_p7 = pnand %p2203_p6, %p2197_p3 }
  0x88   :  { %2207 = shalt.err (!%p2204_p7)
}
  0x89   :  { %88 = dma.hbm_to_vmem [thread:$0]  %s3010_s7, 32, %s86_s6, [#allocation9]  }
  0x8a   :  { %s2208_s8 = scalar_lea.hbm %s3012_s9, 64 }
  0x8b   :  { %p2209_p8 = scmp.ne.s32.totalorder %s3012_s9, %s2208_s8  ;;  %p2212_p9 = scmp.lt.u32.totalorder %s2208_s8, %s3012_s9 }
  0x8d   :  { %p2214_p10 = pnand %p2212_p9, %p2209_p8 }
  0x8f   :  { %2217 = shalt.err (!%p2214_p10)
}
  0x90   :  { %s2218_s4 = scalar_lea.vmem %s108_s19, 64  ;;  %p2223_p12 = scmp.lt.s32.totalorder %s108_s19, %s108_s19 }
  0x91   :  { %p2219_p11 = scmp.ne.s32.totalorder %s108_s19, %s2218_s4  ;;  %p2224_p13 = scmp.lt.s32.totalorder %s2218_s4, %s2218_s4 }
  0x93   :  { %p2225_p0 = por %p2224_p13, %p2223_p12 }
  0x95   :  { %p2226_p1 = pnand %p2225_p0, %p2219_p11 }
  0x97   :  { %2229 = shalt.err (!%p2226_p1)
}
  0x98   :  { %110 = dma.hbm_to_vmem [thread:$0]  %s3012_s9, 64, %s108_s19, [#allocation12]  }
  0x99   :  { %s2347_s27 = smov [#allocation16]   ;;  %s2348_s24 = smov [#allocation19]  }
  0x9a   :  { %s126_s12 = sshll.u32 %s2347_s27, 4  ;;  %s149_s29 = sshll.u32 %s2348_s24, 4  ;;  %s127_s12 = int_to_ptr.vmem [resolvable:$true] %s126_s12  ;;  %s150_s29 = int_to_ptr.vmem [resolvable:$true] %s149_s29 }
  0x9b   :  { %s2230_s10 = scalar_lea.hbm %s3014_s11, 4096 }
  0x9c   :  { %p2231_p2 = scmp.ne.s32.totalorder %s3014_s11, %s2230_s10  ;;  %p2234_p3 = scmp.lt.u32.totalorder %s2230_s10, %s3014_s11 }
  0x9e   :  { %p2236_p4 = pnand %p2234_p3, %p2231_p2 }
  0xa0   :  { %2239 = shalt.err (!%p2236_p4)
}
  0xa1   :  { %s2240_s9 = scalar_lea.vmem %s127_s12, 4096  ;;  %p2245_p6 = scmp.lt.s32.totalorder %s127_s12, %s127_s12 }
  0xa2   :  { %p2241_p5 = scmp.ne.s32.totalorder %s127_s12, %s2240_s9  ;;  %p2246_p7 = scmp.lt.s32.totalorder %s2240_s9, %s2240_s9 }
  0xa4   :  { %p2247_p8 = por %p2246_p7, %p2245_p6 }
  0xa6   :  { %p2248_p9 = pnand %p2247_p8, %p2241_p5 }
  0xa8   :  { %2251 = shalt.err (!%p2248_p9)
}
  0xa9   :  { %132 = dma.hbm_to_vmem [thread:$0]  %s3014_s11, 4096, %s127_s12, [#allocation15], %s2343_s2, %s2343_s2, %s2344_s21  }
  0xaa   :  { %s2252_s25 = scalar_lea.hbm %s3016_s13, 32 }
  0xab   :  { %p2253_p10 = scmp.ne.s32.totalorder %s3016_s13, %s2252_s25  ;;  %p2256_p11 = scmp.lt.u32.totalorder %s2252_s25, %s3016_s13 }
  0xad   :  { %p2258_p12 = pnand %p2256_p11, %p2253_p10 }
  0xaf   :  { %2261 = shalt.err (!%p2258_p12)
}
  0xb0   :  { %s2262_s6 = scalar_lea.vmem %s150_s29, 32  ;;  %p2267_p0 = scmp.lt.s32.totalorder %s150_s29, %s150_s29 }
  0xb1   :  { %p2263_p13 = scmp.ne.s32.totalorder %s150_s29, %s2262_s6  ;;  %p2268_p1 = scmp.lt.s32.totalorder %s2262_s6, %s2262_s6 }
  0xb3   :  { %p2269_p2 = por %p2268_p1, %p2267_p0 }
  0xb5   :  { %p2270_p3 = pnand %p2269_p2, %p2263_p13 }
  0xb7   :  { %2273 = shalt.err (!%p2270_p3)
}
  0xb8   :  { %152 = dma.hbm_to_vmem [thread:$0]  %s3016_s13, 32, %s150_s29, [#allocation18]  }
  0xb9   :  { %2318 = dma.done.wait [#allocation3], 4864  }
  0xba   :  { %2319 = vsyncadd [#allocation3], 4294962432 }
  0xbb   :  { %2320 = dma.done.wait [#allocation6], 4160  }
  0xbc   :  { %2321 = vsyncadd [#allocation6], 4294963136 }
  0xbd   :  { %2322 = dma.done.wait [#allocation9], 64  }
  0xbe   :  { %2323 = vsyncadd [#allocation9], 4294967232 }
  0xbf   :  { %2324 = dma.done.wait [#allocation12], 3264  }
  0xc0   :  { %2325 = vsyncadd [#allocation12], 4294964032 }
  0xc1   :  { %2326 = dma.done.wait [#allocation15], 4160  }
  0xc2   :  { %2327 = vsyncadd [#allocation15], 4294963136 }
  0xc3   :  { %2328 = dma.done.wait [#allocation18], 64  }
  0xc4   :  { %2329 = vsyncadd [#allocation18], 4294967232  ;;  %v193_v0 = vld [vmem:[#allocation2] sm:$0xff]  ;;  %v194_v1 = vld [vmem:[#allocation2 + $0x8] sm:$0xff]  ;;  %vm687_vm0 = vcmask 1045504   ;;  %vm683_vm1 = vcmask 359424  }
  0xc5   :  { %v195_v2 = vld [vmem:[#allocation2 + $0x10] sm:$0xff]  ;;  %v231_v3 = vunpack.c.l.s8.bf16 %v193_v0  ;;  %v233_v4 = vunpack.c.l.s8.bf16 %v194_v1  ;;  %v196_v5 = vld [vmem:[#allocation2 + $0x18] sm:$0xff]  ;;  %v2583_v7 = vld [vmem:[#allocation2 + $0x20] sm:$0xff]  ;;  %v232_v24 = vunpack.c.h.s8.bf16 %v193_v0  ;;  %v234_v25 = vunpack.c.h.s8.bf16 %v194_v1 }
  0xc6   :  { %v235_v6 = vunpack.c.l.s8.bf16 %v195_v2  ;;  %v198_v8 = vld [vmem:[#allocation2 + $0x28] sm:$0xff]  ;;  %v237_v9 = vunpack.c.l.s8.bf16 %v196_v5  ;;  %v239_v12 = vunpack.c.l.s8.bf16 %v2583_v7  ;;  %v2586_v15 = vld [vmem:[#allocation2 + $0x30] sm:$0xff]  ;;  %v2588_v16 = vld [vmem:[#allocation2 + $0x38] sm:$0xff]  ;;  %v236_v39 = vunpack.c.h.s8.bf16 %v195_v2 }
  0xc7   :  { %v1863_v10 = vcombine.high %v231_v3, %v233_v4  ;;  %v1862_v11 = vcombine.low %v231_v3, %v233_v4  ;;  %v241_v13 = vunpack.c.l.s8.bf16 %v198_v8  ;;  %v243_v19 = vunpack.c.l.s8.bf16 %v2586_v15  ;;  %v2592_v21 = vld [vmem:[#allocation2 + $0x40] sm:$0xff]  ;;  %v2594_v22 = vld [vmem:[#allocation2 + $0x48] sm:$0xff]  ;;  %v2598_v29 = vld [vmem:[#allocation2 + $0x50] sm:$0xff] }
  0xc8   :  { %v1867_v14 = vcombine.high %v235_v6, %v237_v9  ;;  %v1866_v17 = vcombine.low %v235_v6, %v237_v9  ;;  %v245_v20 = vunpack.c.l.s8.bf16 %v2588_v16  ;;  %v247_v27 = vunpack.c.l.s8.bf16 %v2592_v21  ;;  %v2600_v30 = vld [vmem:[#allocation2 + $0x58] sm:$0xff]  ;;  %v2604_v37 = vld [vmem:[#allocation2 + $0x60] sm:$0xff]  ;;  %v2606_v38 = vld [vmem:[#allocation2 + $0x68] sm:$0xff] }
  0xc9   :  { %700 = vmatprep.subr.bf16.mxu0 %v1863_v10  ;;  %v1871_v18 = vcombine.high %v239_v12, %v241_v13  ;;  %v1870_v23 = vcombine.low %v239_v12, %v241_v13  ;;  %v249_v28 = vunpack.c.l.s8.bf16 %v2594_v22  ;;  %v251_v32 = vunpack.c.l.s8.bf16 %v2598_v29  ;;  %v188_v45 = vld [vmem:[%s3003_s0 + $0x8] sm:$0xff]  ;;  %v2616_v53 = vld [vmem:[#allocation2 + $0x70] sm:$0xff]  ;;  %v2624_v0 = vld [vmem:[#allocation2 + $0x80] sm:$0xff] }
  0xca   :  { %701 = vmatpush1.bf16.msra.mxu0 %v1862_v11  ;;  %v1875_v26 = vcombine.high %v243_v19, %v245_v20  ;;  %v1874_v31 = vcombine.low %v243_v19, %v245_v20  ;;  %v1865_v33 = vcombine.high %v232_v24, %v234_v25  ;;  %v1864_v34 = vcombine.low %v232_v24, %v234_v25  ;;  %v2618_v54 = vld [vmem:[#allocation2 + $0x78] sm:$0xff]  ;;  %v2626_v1 = vld [vmem:[#allocation2 + $0x88] sm:$0xff]  ;;  %v2632_v10 = vld [vmem:[#allocation2 + $0x90] sm:$0xff] }
  0xcb   :  { %702 = vmatprep.subr.bf16.mxu0 %v1867_v14  ;;  %v1879_v35 = vcombine.high %v247_v27, %v249_v28  ;;  %v253_v36 = vunpack.c.l.s8.bf16 %v2600_v30  ;;  %v238_v40 = vunpack.c.h.s8.bf16 %v196_v5  ;;  %v240_v43 = vunpack.c.h.s8.bf16 %v2583_v7  ;;  %v2634_v11 = vld [vmem:[#allocation2 + $0x98] sm:$0xff]  ;;  %v2640_v20 = vld [vmem:[#allocation2 + $0xa0] sm:$0xff] }
  0xcc   :  { %782 = vmatprep.subr.bf16.mxu1 %v1865_v33  ;;  %v242_v44 = vunpack.c.h.s8.bf16 %v198_v8  ;;  %v1878_v46 = vcombine.low %v247_v27, %v249_v28  ;;  %v255_v47 = vunpack.c.l.s8.bf16 %v2604_v37  ;;  %v257_v48 = vunpack.c.l.s8.bf16 %v2606_v38 }
  0xcd   :  { %783 = vmatpush1.bf16.msra.mxu1 %v1864_v34  ;;  %v1869_v41 = vcombine.high %v236_v39, %v238_v40  ;;  %v1868_v42 = vcombine.low %v236_v39, %v238_v40  ;;  %v1883_v49 = vcombine.high %v251_v32, %v253_v36  ;;  %v244_v51 = vunpack.c.h.s8.bf16 %v2586_v15  ;;  %v2656_v40 = vld [vmem:[#allocation2 + $0xc0] sm:$0xff] }
  0xce   :  { %703 = vmatpush1.bf16.msra.mxu0 %v1866_v17  ;;  %v1873_v50 = vcombine.high %v240_v43, %v242_v44  ;;  %v246_v52 = vunpack.c.h.s8.bf16 %v2588_v16  ;;  %v191_v55 = vpack.c.bf16 %v188_v45, %v188_v45  ;;  %v1872_v56 = vcombine.low %v240_v43, %v242_v44 }
  0xcf   :  { %704 = vmatprep.subr.bf16.mxu0 %v1871_v18  ;;  %784 = vmatprep.subr.bf16.mxu1 %v1869_v41  ;;  %v1882_v57 = vcombine.low %v251_v32, %v253_v36  ;;  %v248_v59 = vunpack.c.h.s8.bf16 %v2592_v21  ;;  %v250_v60 = vunpack.c.h.s8.bf16 %v2594_v22  ;;  %v1887_v61 = vcombine.high %v255_v47, %v257_v48  ;;  %v2642_v21 = vld [vmem:[#allocation2 + $0xa8] sm:$0xff] }
  0xd0   :  { %v1877_v58 = vcombine.high %v244_v51, %v246_v52  ;;  %v259_v62 = vunpack.c.l.s8.bf16 %v2616_v53  ;;  %v261_v63 = vunpack.c.l.s8.bf16 %v2618_v54  ;;  %732 = vmatprep.mubr.bf16.mxu0 %v191_v55  ;;  %814 = vmatprep.mubr.bf16.mxu1 %v191_v55  ;;  %v1876_v2 = vcombine.low %v244_v51, %v246_v52  ;;  %v2658_v41 = vld [vmem:[#allocation2 + $0xc8] sm:$0xff]  ;;  %v2666_v51 = vld [vmem:[#allocation2 + $0xd8] sm:$0xff] }
  0xd1   :  { %785 = vmatpush1.bf16.msra.mxu1 %v1868_v42  ;;  %v1886_v3 = vcombine.low %v255_v47, %v257_v48  ;;  %v1881_v4 = vcombine.high %v248_v59, %v250_v60  ;;  %v252_v5 = vunpack.c.h.s8.bf16 %v2598_v29  ;;  %v254_v6 = vunpack.c.h.s8.bf16 %v2600_v30  ;;  %v2648_v30 = vld [vmem:[#allocation2 + $0xb0] sm:$0xff] }
  0xd2   :  { %705 = vmatpush1.bf16.msra.mxu0 %v1870_v23  ;;  %786 = vmatprep.subr.bf16.mxu1 %v1873_v50  ;;  %v1891_v7 = vcombine.high %v259_v62, %v261_v63  ;;  %v263_v8 = vunpack.c.l.s8.bf16 %v2624_v0  ;;  %v265_v9 = vunpack.c.l.s8.bf16 %v2626_v1  ;;  %v1880_v12 = vcombine.low %v248_v59, %v250_v60  ;;  %v2664_v50 = vld [vmem:[#allocation2 + $0xd0] sm:$0xff]  ;;  %v2672_v60 = vld [vmem:[#allocation2 + $0xe0] sm:$0xff] }
  0xd3   :  { %706 = vmatprep.subr.bf16.mxu0 %v1875_v26  ;;  %v1890_v13 = vcombine.low %v259_v62, %v261_v63  ;;  %v1885_v14 = vcombine.high %v252_v5, %v254_v6  ;;  %v256_v15 = vunpack.c.h.s8.bf16 %v2604_v37  ;;  %v258_v16 = vunpack.c.h.s8.bf16 %v2606_v38 }
  0xd4   :  { %v1895_v17 = vcombine.high %v263_v8, %v265_v9  ;;  %v267_v18 = vunpack.c.l.s8.bf16 %v2632_v10  ;;  %v269_v19 = vunpack.c.l.s8.bf16 %v2634_v11  ;;  %v1884_v22 = vcombine.low %v252_v5, %v254_v6  ;;  %v2680_v6 = vld [vmem:[#allocation2 + $0xf0] sm:$0xff] }
  0xd5   :  { %787 = vmatpush1.bf16.msra.mxu1 %v1872_v56  ;;  %v1894_v23 = vcombine.low %v263_v8, %v265_v9  ;;  %v1889_v24 = vcombine.high %v256_v15, %v258_v16  ;;  %v260_v25 = vunpack.c.h.s8.bf16 %v2616_v53  ;;  %v262_v26 = vunpack.c.h.s8.bf16 %v2618_v54 }
  0xd6   :  { %707 = vmatpush1.bf16.msra.mxu0 %v1874_v31  ;;  %788 = vmatprep.subr.bf16.mxu1 %v1877_v58  ;;  %v1899_v27 = vcombine.high %v267_v18, %v269_v19  ;;  %v271_v28 = vunpack.c.l.s8.bf16 %v2640_v20  ;;  %v273_v29 = vunpack.c.l.s8.bf16 %v2642_v21  ;;  %v2650_v31 = vld [vmem:[#allocation2 + $0xb8] sm:$0xff]  ;;  %v1888_v32 = vcombine.low %v256_v15, %v258_v16  ;;  %v2688_v16 = vld [vmem:[#allocation2 + $0x100] sm:$0xff] }
  0xd7   :  { %708 = vmatprep.subr.bf16.mxu0 %v1879_v35  ;;  %v1898_v33 = vcombine.low %v267_v18, %v269_v19  ;;  %v1893_v34 = vcombine.high %v260_v25, %v262_v26  ;;  %v264_v35 = vunpack.c.h.s8.bf16 %v2624_v0  ;;  %v266_v36 = vunpack.c.h.s8.bf16 %v2626_v1 }
  0xd8   :  { %v1903_v37 = vcombine.high %v271_v28, %v273_v29  ;;  %v275_v38 = vunpack.c.l.s8.bf16 %v2648_v30  ;;  %v277_v39 = vunpack.c.l.s8.bf16 %v2650_v31  ;;  %v1892_v42 = vcombine.low %v260_v25, %v262_v26  ;;  %v2696_v26 = vld [vmem:[#allocation2 + $0x110] sm:$0xff] }
  0xd9   :  { %789 = vmatpush1.bf16.msra.mxu1 %v1876_v2  ;;  %v1902_v43 = vcombine.low %v271_v28, %v273_v29  ;;  %v1897_v44 = vcombine.high %v264_v35, %v266_v36  ;;  %v268_v45 = vunpack.c.h.s8.bf16 %v2632_v10  ;;  %v279_v48 = vunpack.c.l.s8.bf16 %v2656_v40 }
  0xda   :  { %709 = vmatpush1.bf16.msra.mxu0 %v1878_v46  ;;  %790 = vmatprep.subr.bf16.mxu1 %v1881_v4  ;;  %v270_v46 = vunpack.c.h.s8.bf16 %v2634_v11  ;;  %v1907_v47 = vcombine.high %v275_v38, %v277_v39  ;;  %v1896_v52 = vcombine.low %v264_v35, %v266_v36  ;;  %v1906_v53 = vcombine.low %v275_v38, %v277_v39  ;;  %v230_v38 = vld [vmem:[#allocation2 + $0x128] sm:$0x55] }
  0xdb   :  { %710 = vmatprep.subr.bf16.mxu0 %v1883_v49  ;;  %v281_v49 = vunpack.c.l.s8.bf16 %v2658_v41  ;;  %v272_v55 = vunpack.c.h.s8.bf16 %v2640_v20  ;;  %v274_v56 = vunpack.c.h.s8.bf16 %v2642_v21  ;;  %v283_v58 = vunpack.c.l.s8.bf16 %v2664_v50 }
  0xdc   :  { %v1901_v54 = vcombine.high %v268_v45, %v270_v46  ;;  %v285_v59 = vunpack.c.l.s8.bf16 %v2666_v51  ;;  %v1900_v62 = vcombine.low %v268_v45, %v270_v46  ;;  %v276_v1 = vunpack.c.h.s8.bf16 %v2648_v30  ;;  %v187_v30 = vld [vmem:[%s3003_s0] sm:$0xff] }
  0xdd   :  { %791 = vmatpush1.bf16.msra.mxu1 %v1880_v12  ;;  %v1910_v63 = vcombine.low %v279_v48, %v281_v49  ;;  %v1905_v0 = vcombine.high %v272_v55, %v274_v56  ;;  %v278_v2 = vunpack.c.h.s8.bf16 %v2650_v31  ;;  %v287_v4 = vunpack.c.l.s8.bf16 %v2672_v60 }
  0xde   :  { %711 = vmatpush1.bf16.msra.mxu0 %v1882_v57  ;;  %792 = vmatprep.subr.bf16.mxu1 %v1885_v14  ;;  %v1911_v57 = vcombine.high %v279_v48, %v281_v49  ;;  %v1904_v8 = vcombine.low %v272_v55, %v274_v56  ;;  %v1914_v9 = vcombine.low %v283_v58, %v285_v59  ;;  %v280_v11 = vunpack.c.h.s8.bf16 %v2656_v40  ;;  %v921_v56 = vld [vmem:[#allocation7 + $0x8] sm:$0xff] }
  0xdf   :  { %712 = vmatprep.subr.bf16.mxu0 %v1887_v61  ;;  %v2674_v61 = vld [vmem:[#allocation2 + $0xe8] sm:$0xff]  ;;  %v1909_v10 = vcombine.high %v276_v1, %v278_v2  ;;  %v282_v12 = vunpack.c.h.s8.bf16 %v2658_v41  ;;  %v291_v14 = vunpack.c.l.s8.bf16 %v2680_v6  ;;  %v1908_v18 = vcombine.low %v276_v1, %v278_v2 }
  0xe0   :  { %v289_v5 = vunpack.c.l.s8.bf16 %v2674_v61  ;;  %v284_v21 = vunpack.c.h.s8.bf16 %v2664_v50  ;;  %v299_v31 = vunpack.c.l.s8.bf16 %v2696_v26  ;;  %v288_v35 = vunpack.c.h.s8.bf16 %v2672_v60 }
  0xe1   :  { %793 = vmatpush1.bf16.msra.mxu1 %v1884_v22  ;;  %v1913_v20 = vcombine.high %v280_v11, %v282_v12  ;;  %v286_v22 = vunpack.c.h.s8.bf16 %v2666_v51  ;;  %v1912_v28 = vcombine.low %v280_v11, %v282_v12  ;;  %v290_v36 = vunpack.c.h.s8.bf16 %v2674_v61 }
  0xe2   :  { %713 = vmatpush1.bf16.msra.mxu0 %v1886_v3  ;;  %794 = vmatprep.subr.bf16.mxu1 %v1889_v24  ;;  %v1915_v3 = vcombine.high %v283_v58, %v285_v59  ;;  %v1918_v19 = vcombine.low %v287_v4, %v289_v5  ;;  %v295_v24 = vunpack.c.l.s8.bf16 %v2688_v16  ;;  %v190_v39 = vpack.c.bf16 %v187_v30, %v187_v30  ;;  %v189_v58 = vld [vmem:[%s3003_s0 + $0x10] sm:$0xff] }
  0xe3   :  { %714 = vmatprep.subr.bf16.mxu0 %v1891_v7  ;;  %v2682_v7 = vld [vmem:[#allocation2 + $0xf8] sm:$0xff]  ;;  %v1916_v40 = vcombine.low %v284_v21, %v286_v22  ;;  %v305_v46 = vunpack.c.l.s8.bf16 %v230_v38  ;;  %v1920_v48 = vcombine.low %v288_v35, %v290_v36  ;;  %v2349_v50 = vmov 0  }
  0xe4   :  { %v293_v15 = vunpack.c.l.s8.bf16 %v2682_v7  ;;  %v300_v60 = vunpack.c.h.s8.bf16 %v2696_v26  ;;  %v192_v1 = vpack.c.bf16 %v189_v58, %v189_v58  ;;  %v929_v30 = vld [vmem:[#allocation7 + $0x48] sm:$0xff]  ;;  %vm1461_vm2 = vcmask 588800  }
  0xe5   :  { %795 = vmatpush1.bf16.msra.mxu1 %v1888_v32  ;;  %v1917_v32 = vcombine.high %v284_v21, %v286_v22  ;;  %v924_v21 = vld [vmem:[#allocation7 + $0x20] sm:$0xff]  ;;  %v2731_v58 = vld [vmem:[#allocation11 + $0x8] sm:$0xff]  ;;  %vm1465_vm3 = vcmask 1043456  }
  0xe6   :  { %715 = vmatpush1.bf16.msra.mxu0 %v1890_v13  ;;  %796 = vmatprep.subr.bf16.mxu1 %v1893_v34  ;;  %v1919_v13 = vcombine.high %v287_v4, %v289_v5  ;;  %v1922_v29 = vcombine.low %v291_v14, %v293_v15  ;;  %v306_v5 = vunpack.c.h.s8.bf16 %v230_v38  ;;  %v960_v22 = vunpack.c.l.s8.bf16 %v924_v21 }
  0xe7   :  { %716 = vmatprep.subr.bf16.mxu0 %v1895_v17  ;;  %v2690_v17 = vld [vmem:[#allocation2 + $0x108] sm:$0xff] }
  0xe8   :  { %v297_v25 = vunpack.c.l.s8.bf16 %v2690_v17 }
  0xe9   :  { %797 = vmatpush1.bf16.msra.mxu1 %v1892_v42  ;;  %v292_v42 = vunpack.c.h.s8.bf16 %v2680_v6 }
  0xea   :  { %717 = vmatpush1.bf16.msra.mxu0 %v1894_v23  ;;  %798 = vmatprep.subr.bf16.mxu1 %v1897_v44  ;;  %v1923_v23 = vcombine.high %v291_v14, %v293_v15  ;;  %v1926_v41 = vcombine.low %v295_v24, %v297_v25  ;;  %v922_v14 = vld [vmem:[#allocation7 + $0x10] sm:$0xff] }
  0xeb   :  { %718 = vmatprep.subr.bf16.mxu0 %v1899_v27  ;;  %v2698_v27 = vld [vmem:[#allocation2 + $0x118] sm:$0xff] }
  0xec   :  { %v301_v34 = vunpack.c.l.s8.bf16 %v2698_v27  ;;  %v302_v61 = vunpack.c.h.s8.bf16 %v2698_v27  ;;  %v926_v27 = vld [vmem:[#allocation7 + $0x30] sm:$0xff] }
  0xed   :  { %799 = vmatpush1.bf16.msra.mxu1 %v1896_v52  ;;  %v296_v52 = vunpack.c.h.s8.bf16 %v2688_v16  ;;  %v956_v16 = vunpack.c.l.s8.bf16 %v922_v14 }
  0xee   :  { %719 = vmatpush1.bf16.msra.mxu0 %v1898_v33  ;;  %800 = vmatprep.subr.bf16.mxu1 %v1901_v54  ;;  %v1927_v33 = vcombine.high %v295_v24, %v297_v25  ;;  %v1931_v44 = vcombine.high %v299_v31, %v301_v34  ;;  %v1930_v49 = vcombine.low %v299_v31, %v301_v34  ;;  %v927_v24 = vld [vmem:[#allocation7 + $0x38] sm:$0xff]  ;;  %v962_v25 = vunpack.c.h.s8.bf16 %v924_v21 }
  0xef   :  { %720 = vmatprep.subr.bf16.mxu0 %v1903_v37  ;;  %v2707_v37 = vld [vmem:[#allocation2 + $0x120] sm:$0xff]  ;;  %v965_v26 = vunpack.c.l.s8.bf16 %v927_v24  ;;  %v966_v31 = vunpack.c.h.s8.bf16 %v926_v27 }
  0xf0   :  { %v303_v45 = vunpack.c.l.s8.bf16 %v2707_v37  ;;  %v304_v4 = vunpack.c.h.s8.bf16 %v2707_v37 }
  0xf1   :  { %801 = vmatpush1.bf16.msra.mxu1 %v1900_v62 }
  0xf2   :  { %721 = vmatpush1.bf16.msra.mxu0 %v1902_v43  ;;  %802 = vmatprep.subr.bf16.mxu1 %v1905_v0  ;;  %v294_v43 = vunpack.c.h.s8.bf16 %v2682_v7  ;;  %v1935_v54 = vcombine.high %v303_v45, %v305_v46  ;;  %v1934_v55 = vcombine.low %v303_v45, %v305_v46  ;;  %v920_v0 = vld [vmem:[#allocation7] sm:$0xff]  ;;  %v955_v7 = vunpack.c.h.s8.bf16 %v921_v56 }
  0xf3   :  { %722 = vmatprep.subr.bf16.mxu0 %v1907_v47  ;;  %v1921_v47 = vcombine.high %v288_v35, %v290_v36  ;;  %v952_v6 = vunpack.c.l.s8.bf16 %v920_v0  ;;  %v1936_v11 = vcombine.low %v304_v4, %v306_v5  ;;  %v954_v12 = vunpack.c.h.s8.bf16 %v920_v0  ;;  %v931_v36 = vld [vmem:[#allocation7 + $0x58] sm:$0xff]  ;;  %v932_v45 = vld [vmem:[#allocation7 + $0x60] sm:$0xff] }
  0xf4   :  { %v1925_v51 = vcombine.high %v292_v42, %v294_v43  ;;  %v689_v62 = vsel %vm687_vm0, %v1934_v55, 0  ;;  %v971_v35 = vunpack.c.h.s8.bf16 %v929_v30  ;;  %v973_v38 = vunpack.c.l.s8.bf16 %v931_v36  ;;  %v2726_v55 = vld [vmem:[#allocation7 + $0x88] sm:$0xff]  ;;  %v2741_v0 = vld [vmem:[#allocation11 + $0x18] sm:$0xff] }
  0xf5   :  { %803 = vmatpush1.bf16.msra.mxu1 %v1904_v8  ;;  %v1932_v8 = vcombine.low %v300_v60, %v302_v61  ;;  %v695_v15 = vsel %vm687_vm0, %v1936_v11, 0  ;;  %v976_v46 = vunpack.c.l.s8.bf16 %v932_v45  ;;  %v2759_v11 = vld [vmem:[#allocation11 + $0x30] sm:$0xff] }
  0xf6   :  { %723 = vmatpush1.bf16.msra.mxu0 %v1906_v53  ;;  %804 = vmatprep.subr.bf16.mxu1 %v1909_v10  ;;  %v298_v53 = vunpack.c.h.s8.bf16 %v2690_v17  ;;  %v1937_v10 = vcombine.high %v304_v4, %v306_v5  ;;  %v2749_v5 = vld [vmem:[#allocation11 + $0x20] sm:$0xff] }
  0xf7   :  { %724 = vmatprep.subr.bf16.mxu0 %v1911_v57  ;;  %v1924_v57 = vcombine.low %v292_v42, %v294_v43  ;;  %v933_v42 = vld [vmem:[#allocation7 + $0x68] sm:$0xff] }
  0xf8   :  { %v1929_v59 = vcombine.high %v296_v52, %v298_v53  ;;  %v1928_v2 = vcombine.low %v296_v52, %v298_v53 }
  0xf9   :  { %805 = vmatpush1.bf16.msra.mxu1 %v1908_v18  ;;  %v925_v18 = vld [vmem:[#allocation7 + $0x28] sm:$0xff] }
  0xfa   :  { %725 = vmatpush1.bf16.msra.mxu0 %v1910_v63  ;;  %806 = vmatprep.subr.bf16.mxu1 %v1913_v20  ;;  %v953_v63 = vunpack.c.l.s8.bf16 %v921_v56  ;;  %v961_v20 = vunpack.c.l.s8.bf16 %v925_v18  ;;  %v985_v56 = vunpack.c.l.s8.bf16 %v2726_v55 }
  0xfb   :  { %726 = vmatprep.subr.bf16.mxu0 %v1915_v3  ;;  %v1933_v3 = vcombine.high %v300_v60, %v302_v61  ;;  %v1163_v60 = vunpack.c.l.s8.bf16 %v2731_v58 }
  0xfd   :  { %807 = vmatpush1.bf16.msra.mxu1 %v1912_v28  ;;  %v964_v28 = vunpack.c.l.s8.bf16 %v926_v27 }
  0xfe   :  { %727 = vmatpush1.bf16.msra.mxu0 %v1914_v9  ;;  %808 = vmatprep.subr.bf16.mxu1 %v1917_v32  ;;  %v923_v9 = vld [vmem:[#allocation7 + $0x18] sm:$0xff]  ;;  %v969_v32 = vunpack.c.l.s8.bf16 %v929_v30  ;;  %v2791_v30 = vld [vmem:[#allocation11 + $0x68] sm:$0xff] }
  0xff   :  { %728 = vmatprep.subr.bf16.mxu0 %v1919_v13  ;;  %v957_v13 = vunpack.c.l.s8.bf16 %v923_v9  ;;  %v959_v17 = vunpack.c.h.s8.bf16 %v923_v9 }
 0x101   :  { %809 = vmatpush1.bf16.msra.mxu1 %v1916_v40 }
 0x102   :  { %729 = vmatpush1.bf16.msra.mxu0 %v1918_v19  ;;  %810 = vmatprep.subr.bf16.mxu1 %v1921_v47  ;;  %v958_v19 = vunpack.c.h.s8.bf16 %v922_v14  ;;  %v979_v47 = vunpack.c.h.s8.bf16 %v933_v42 }
 0x103   :  { %730 = vmatprep.subr.bf16.mxu0 %v1923_v23  ;;  %v963_v23 = vunpack.c.h.s8.bf16 %v925_v18  ;;  %v2771_v18 = vld [vmem:[#allocation11 + $0x48] sm:$0xff] }
 0x105   :  { %811 = vmatpush1.bf16.msra.mxu1 %v1920_v48  ;;  %v978_v48 = vunpack.c.h.s8.bf16 %v932_v45 }
 0x106   :  { %731 = vmatpush1.bf16.msra.mxu0 %v1922_v29  ;;  %812 = vmatprep.subr.bf16.mxu1 %v1925_v51  ;;  %v967_v29 = vunpack.c.h.s8.bf16 %v927_v24  ;;  %v934_v51 = vld [vmem:[#allocation7 + $0x70] sm:$0xff]  ;;  %v2781_v24 = vld [vmem:[#allocation11 + $0x58] sm:$0xff] }
 0x107   :  { %741 = vmatprep.subr.bf16.mxu0 %v1927_v33  ;;  %v928_v33 = vld [vmem:[#allocation7 + $0x40] sm:$0xff]  ;;  %v980_v52 = vunpack.c.l.s8.bf16 %v934_v51 }
 0x108   :  { %v968_v34 = vunpack.c.l.s8.bf16 %v928_v33  ;;  %v970_v37 = vunpack.c.h.s8.bf16 %v928_v33 }
 0x109   :  { %733 = vmatmul.mubr.bf16.vlgmr.msra.gmra.mrb[0].mxu0 %v190_v39  ;;  %813 = vmatpush1.bf16.msra.mxu1 %v1924_v57  ;;  %v2729_v57 = vld [vmem:[#allocation11] sm:$0xff] }
 0x10a   :  { %742 = vmatpush1.bf16.msra.mxu0 %v1926_v41  ;;  %773 = vmatprep.mubr.bf16.mxu0 %v2349_v50  ;;  %v975_v41 = vunpack.c.h.s8.bf16 %v931_v36  ;;  %v2801_v36 = vld [vmem:[#allocation11 + $0x78] sm:$0xff] }
 0x10b   :  { %743 = vmatprep.subr.bf16.mxu0 %v1931_v44  ;;  %823 = vmatprep.subr.bf16.mxu1 %v1929_v59  ;;  %v977_v44 = vunpack.c.l.s8.bf16 %v933_v42  ;;  %v1161_v59 = vunpack.c.l.s8.bf16 %v2729_v57  ;;  %v2811_v42 = vld [vmem:[#allocation11 + $0x88] sm:$0xff] }
 0x10c   :  { %815 = vmatmul.mubr.bf16.vlgmr.msra.gmra.mrb[0].mxu1 %v190_v39  ;;  %v930_v39 = vld [vmem:[#allocation7 + $0x50] sm:$0xff] }
 0x10d   :  { %824 = vmatpush1.bf16.msra.mxu1 %v1928_v2  ;;  %855 = vmatprep.mubr.bf16.mxu1 %v2349_v50  ;;  %v972_v40 = vunpack.c.l.s8.bf16 %v930_v39  ;;  %v974_v43 = vunpack.c.h.s8.bf16 %v930_v39  ;;  %v2735_v61 = vcombine.high %v1161_v59, %v1163_v60  ;;  %v1167_v2 = vunpack.c.l.s8.bf16 %v2741_v0 }
 0x10e   :  { %744 = vmatpush1.bf16.msra.mxu0 %v1930_v49  ;;  %825 = vmatprep.subr.bf16.mxu1 %v1933_v3  ;;  %v935_v49 = vld [vmem:[#allocation7 + $0x78] sm:$0xff] }
 0x10f   :  { %1938 = vmatprep.subr.msk.bf16.mxu0 %vm687_vm0, %v1935_v54  ;;  %v981_v50 = vunpack.c.l.s8.bf16 %v935_v49  ;;  %v983_v53 = vunpack.c.h.s8.bf16 %v935_v49  ;;  %v982_v54 = vunpack.c.h.s8.bf16 %v934_v51 }
 0x111   :  { %826 = vmatpush1.bf16.msra.mxu1 %v1932_v8 }
 0x112   :  { %746 = vmatpush1.bf16.msra.mxu0 %v689_v62  ;;  %1940 = vmatprep.subr.msk.bf16.mxu1 %vm687_vm0, %v1937_v10  ;;  %v2737_v62 = vcombine.low %v1161_v59, %v1163_v60  ;;  %v866_v60 = vlaneseq }
 0x113   :  { %1020 = vmatprep.subr.bf16.mxu0 %v953_v63  ;;  %v2739_v63 = vld [vmem:[#allocation11 + $0x10] sm:$0xff] }
 0x115   :  { %1939 = vmatmul.mubr.msk.bf16.vlgmr.msra.gmra.mrb[0].mxu0 %vm683_vm1, %v192_v1  ;;  %828 = vmatpush1.bf16.msra.mxu1 %v695_v15 }
 0x116   :  { %1021 = vmatpush1.bf16.msra.mxu0 %v952_v6  ;;  %v2751_v6 = vld [vmem:[#allocation11 + $0x28] sm:$0xff] }
 0x117   :  { %1022 = vmatprep.subr.bf16.mxu0 %v955_v7  ;;  %v1169_v7 = vunpack.c.l.s8.bf16 %v2749_v5  ;;  %v1171_v8 = vunpack.c.l.s8.bf16 %v2751_v6 }
 0x118   :  { %1941 = vmatmul.mubr.msk.bf16.vlgmr.msra.gmra.mrb[0].mxu1 %vm683_vm1, %v192_v1  ;;  %v1165_v1 = vunpack.c.l.s8.bf16 %v2739_v63 }
 0x119   :  { %v2755_v9 = vcombine.high %v1169_v7, %v1171_v8  ;;  %v2757_v10 = vcombine.low %v1169_v7, %v1171_v8  ;;  %v2839_v7 = vld [vmem:[#allocation11 + $0xb0] sm:$0xff]  ;;  %v2841_v8 = vld [vmem:[#allocation11 + $0xb8] sm:$0xff] }
 0x11a   :  { %1023 = vmatpush1.bf16.msra.mxu0 %v954_v12  ;;  %v2745_v3 = vcombine.high %v1165_v1, %v1167_v2  ;;  %v2747_v4 = vcombine.low %v1165_v1, %v1167_v2  ;;  %v2761_v12 = vld [vmem:[#allocation11 + $0x38] sm:$0xff] }
 0x11b   :  { %1024 = vmatprep.subr.bf16.mxu0 %v957_v13  ;;  %v1173_v13 = vunpack.c.l.s8.bf16 %v2759_v11  ;;  %v1175_v14 = vunpack.c.l.s8.bf16 %v2761_v12 }
 0x11d   :  { %v2765_v15 = vcombine.high %v1173_v13, %v1175_v14 }
 0x11e   :  { %1025 = vmatpush1.bf16.msra.mxu0 %v956_v16  ;;  %v2767_v16 = vcombine.low %v1173_v13, %v1175_v14  ;;  %v1205_v13 = vunpack.c.l.s8.bf16 %v2839_v7  ;;  %v1207_v14 = vunpack.c.l.s8.bf16 %v2841_v8 }
 0x11f   :  { %1026 = vmatprep.subr.bf16.mxu0 %v959_v17  ;;  %v2769_v17 = vld [vmem:[#allocation11 + $0x40] sm:$0xff] }
 0x122   :  { %1027 = vmatpush1.bf16.msra.mxu0 %v958_v19  ;;  %v1177_v19 = vunpack.c.l.s8.bf16 %v2769_v17 }
 0x123   :  { %1028 = vmatprep.subr.bf16.mxu0 %v961_v20  ;;  %v1179_v20 = vunpack.c.l.s8.bf16 %v2771_v18 }
 0x125   :  { %v2775_v21 = vcombine.high %v1177_v19, %v1179_v20 }
 0x126   :  { %1029 = vmatpush1.bf16.msra.mxu0 %v960_v22  ;;  %v2777_v22 = vcombine.low %v1177_v19, %v1179_v20  ;;  %v867_v19 = vshrl.u32 %v866_v60, 7  ;;  %v2845_v20 = vcombine.high %v1205_v13, %v1207_v14  ;;  %v1166_v60 = vunpack.c.h.s8.bf16 %v2739_v63 }
 0x127   :  { %1030 = vmatprep.subr.bf16.mxu0 %v963_v23  ;;  %v2779_v23 = vld [vmem:[#allocation11 + $0x50] sm:$0xff] }
 0x128   :  { %3031 = vst [vmem:[#allocation39_spill] sm:$0xff] %v2845_v20 }
 0x12a   :  { %1031 = vmatpush1.bf16.msra.mxu0 %v962_v25  ;;  %v1181_v25 = vunpack.c.l.s8.bf16 %v2779_v23 }
 0x12b   :  { %1032 = vmatprep.subr.bf16.mxu0 %v965_v26  ;;  %v1183_v26 = vunpack.c.l.s8.bf16 %v2781_v24 }
 0x12d   :  { %v2785_v27 = vcombine.high %v1181_v25, %v1183_v26 }
 0x12e   :  { %1033 = vmatpush1.bf16.msra.mxu0 %v964_v28  ;;  %v2787_v28 = vcombine.low %v1181_v25, %v1183_v26  ;;  %v2847_v25 = vcombine.low %v1205_v13, %v1207_v14  ;;  %v2849_v26 = vsub.s32 0, %v867_v19  ;;  %v1168_v13 = vunpack.c.h.s8.bf16 %v2741_v0  ;;  %v936_v0 = vld [vmem:[#allocation7 + $0x80] sm:$0xff] }
 0x12f   :  { %1034 = vmatprep.subr.bf16.mxu0 %v967_v29  ;;  %v2789_v29 = vld [vmem:[#allocation11 + $0x60] sm:$0xff] }
 0x130   :  { %3032 = vst [vmem:[#allocation40_spill] sm:$0xff] %v2847_v25  ;;  %3033 = vst [vmem:[#allocation41_spill] sm:$0xff] %v2849_v26  ;;  %v1172_v25 = vunpack.c.h.s8.bf16 %v2751_v6 }
 0x132   :  { %1035 = vmatpush1.bf16.msra.mxu0 %v966_v31  ;;  %v1185_v31 = vunpack.c.l.s8.bf16 %v2789_v29 }
 0x133   :  { %1036 = vmatprep.subr.bf16.mxu0 %v969_v32  ;;  %v1187_v32 = vunpack.c.l.s8.bf16 %v2791_v30 }
 0x135   :  { %v2795_v33 = vcombine.high %v1185_v31, %v1187_v32 }
 0x136   :  { %1037 = vmatpush1.bf16.msra.mxu0 %v968_v34  ;;  %v2797_v34 = vcombine.low %v1185_v31, %v1187_v32  ;;  %v2854_v31 = vld [vmem:[%s3006_s3] sm:$0xf]  ;;  %v2856_v32 = vsub.s32 1, %v867_v19 }
 0x137   :  { %1038 = vmatprep.subr.bf16.mxu0 %v971_v35  ;;  %v2799_v35 = vld [vmem:[#allocation11 + $0x70] sm:$0xff] }
 0x138   :  { %3034 = vst [vmem:[#allocation42_spill] sm:$0xff] %v2856_v32 }
 0x13a   :  { %1039 = vmatpush1.bf16.msra.mxu0 %v970_v37  ;;  %v1189_v37 = vunpack.c.l.s8.bf16 %v2799_v35 }
 0x13b   :  { %1040 = vmatprep.subr.bf16.mxu0 %v973_v38  ;;  %v1191_v38 = vunpack.c.l.s8.bf16 %v2801_v36 }
 0x13d   :  { %v2805_v39 = vcombine.high %v1189_v37, %v1191_v38 }
 0x13e   :  { %1041 = vmatpush1.bf16.msra.mxu0 %v972_v40  ;;  %v2807_v40 = vcombine.low %v1189_v37, %v1191_v38  ;;  %v2858_v37 = vld [vmem:[#allocation5] sm:$0xf]  ;;  %v1133_v38 = vld [vmem:[%s3004_s1 + $0x8] sm:$0xff] }
 0x13f   :  { %1042 = vmatprep.subr.bf16.mxu0 %v975_v41  ;;  %3023 = vst [vmem:[#allocation31_spill] sm:$0xff] %v2805_v39  ;;  %v2809_v41 = vld [vmem:[#allocation11 + $0x80] sm:$0xff]  ;;  %v2883_v39 = vsub.s32 3, %v867_v19 }
 0x140   :  { %3024 = vst [vmem:[#allocation32_spill] sm:$0xff] %v2807_v40  ;;  %v2881_v40 = vsub.s32 2, %v867_v19 }
 0x141   :  { %v881_v19 = vrot.slane %v2854_v31, %v2883_v39 }
 0x142   :  { %1043 = vmatpush1.bf16.msra.mxu0 %v974_v43  ;;  %v1193_v43 = vunpack.c.l.s8.bf16 %v2809_v41 }
 0x143   :  { %1044 = vmatprep.subr.bf16.mxu0 %v977_v44  ;;  %v1195_v44 = vunpack.c.l.s8.bf16 %v2811_v42 }
 0x145   :  { %v2815_v45 = vcombine.high %v1193_v43, %v1195_v44 }
 0x146   :  { %1045 = vmatpush1.bf16.msra.mxu0 %v976_v46  ;;  %v2817_v46 = vcombine.low %v1193_v43, %v1195_v44  ;;  %v2863_v43 = vpack.c.bf16 %v1133_v38, %v1133_v38  ;;  %v869_v44 = vrot.slane %v2854_v31, %v2849_v26  ;;  %v899_v38 = vrot.slane %v2858_v37, %v2856_v32 }
 0x147   :  { %1046 = vmatprep.subr.bf16.mxu0 %v979_v47  ;;  %3025 = vst [vmem:[#allocation33_spill] sm:$0xff] %v2815_v45  ;;  %v2819_v47 = vld [vmem:[#allocation11 + $0x90] sm:$0xff] }
 0x148   :  { %3026 = vst [vmem:[#allocation34_spill] sm:$0xff] %v2817_v46  ;;  %v1197_v49 = vunpack.c.l.s8.bf16 %v2819_v47  ;;  %1997 = vmatprep.mubr.msk.bf16.mxu1 %vm1461_vm2, %v2863_v43 }
 0x14a   :  { %1047 = vmatpush1.bf16.msra.mxu0 %v978_v48  ;;  %v2821_v48 = vld [vmem:[#allocation11 + $0x98] sm:$0xff] }
 0x14b   :  { %1048 = vmatprep.subr.bf16.mxu0 %v981_v50  ;;  %v1199_v50 = vunpack.c.l.s8.bf16 %v2821_v48 }
 0x14d   :  { %v2825_v51 = vcombine.high %v1197_v49, %v1199_v50 }
 0x14e   :  { %1049 = vmatpush1.bf16.msra.mxu0 %v980_v52  ;;  %v2827_v52 = vcombine.low %v1197_v49, %v1199_v50  ;;  %v895_v49 = vrot.slane %v2858_v37, %v2849_v26  ;;  %v873_v50 = vrot.slane %v2854_v31, %v2856_v32  ;;  %v1170_v26 = vunpack.c.h.s8.bf16 %v2749_v5 }
 0x14f   :  { %1050 = vmatprep.subr.bf16.mxu0 %v983_v53  ;;  %3027 = vst [vmem:[#allocation35_spill] sm:$0xff] %v2825_v51  ;;  %v2829_v53 = vld [vmem:[#allocation11 + $0xa0] sm:$0xff]  ;;  %v1949_v51 = vcombine.high %v1166_v60, %v1168_v13  ;;  %v1948_v5 = vcombine.low %v1166_v60, %v1168_v13  ;;  %v907_v60 = vrot.slane %v2858_v37, %v2883_v39  ;;  %v938_v13 = vld [vmem:[#allocation7 + $0x90] sm:$0xff] }
 0x150   :  { %3028 = vst [vmem:[#allocation36_spill] sm:$0xff] %v2827_v52  ;;  %v1953_v6 = vcombine.high %v1170_v26, %v1172_v25 }
 0x152   :  { %1051 = vmatpush1.bf16.msra.mxu0 %v982_v54  ;;  %v2831_v54 = vld [vmem:[#allocation11 + $0xa8] sm:$0xff] }
 0x153   :  { %1061 = vmatprep.subr.bf16.mxu0 %v985_v56  ;;  %v1201_v56 = vunpack.c.l.s8.bf16 %v2829_v53  ;;  %v1203_v59 = vunpack.c.l.s8.bf16 %v2831_v54 }
 0x155   :  { %v2835_v1 = vcombine.high %v1201_v56, %v1203_v59  ;;  %v2837_v2 = vcombine.low %v1201_v56, %v1203_v59  ;;  %v1162_v56 = vunpack.c.h.s8.bf16 %v2729_v57  ;;  %v1164_v59 = vunpack.c.h.s8.bf16 %v2731_v58 }
 0x157   :  { %3029 = vst [vmem:[#allocation37_spill] sm:$0xff] %v2835_v1  ;;  %3030 = vst [vmem:[#allocation38_spill] sm:$0xff] %v2837_v2  ;;  %v1945_v1 = vcombine.high %v1162_v56, %v1164_v59  ;;  %v1944_v52 = vcombine.low %v1162_v56, %v1164_v59  ;;  %v1176_v56 = vunpack.c.h.s8.bf16 %v2761_v12  ;;  %v1180_v12 = vunpack.c.h.s8.bf16 %v2771_v18 }
 0x159   :  { %1519 = vmatprep.subr.bf16.mxu1 %v1945_v1 }
 0x15a   :  { %1520 = vmatpush1.bf16.msra.mxu1 %v1944_v52  ;;  %v1952_v52 = vcombine.low %v1170_v26, %v1172_v25 }
 0x15b   :  { %1521 = vmatprep.subr.bf16.mxu1 %v1949_v51 }
 0x15e   :  { %1522 = vmatpush1.bf16.msra.mxu1 %v1948_v5 }
 0x15f   :  { %1523 = vmatprep.subr.bf16.mxu1 %v1953_v6 }
 0x162   :  { %1524 = vmatpush1.bf16.msra.mxu1 %v1952_v52  ;;  %v940_v52 = vld [vmem:[#allocation7 + $0xa0] sm:$0xff] }
 0x1e8   :  { %v775_v14 = vpop.f32.mrb[0].mxu0 }
 0x1e9   :  { %v886_v20 = vmul.f32 %v869_v44, %v775_v14  ;;  %v777_v2 = vpop.f32.mrb[1].mxu0  ;;  %v1174_v44 = vunpack.c.h.s8.bf16 %v2759_v11  ;;  %v1178_v11 = vunpack.c.h.s8.bf16 %v2769_v17 }
 0x1ea   :  { %v887_v57 = vmul.f32 %v873_v50, %v777_v2  ;;  %v779_v46 = vpop.f32.mrb[2].mxu0  ;;  %v939_v50 = vld [vmem:[#allocation7 + $0x98] sm:$0xff] }
 0x1eb   :  { %v912_v58 = vadd.f32 %v895_v49, %v886_v20  ;;  %v780_v45 = vpop.f32.mrb[3].mxu0  ;;  %v984_v46 = vunpack.c.l.s8.bf16 %v936_v0  ;;  %v877_v20 = vrot.slane %v2854_v31, %v2881_v40  ;;  %v1957_v51 = vcombine.high %v1174_v44, %v1176_v56  ;;  %v857_v59 = vpop.f32.mrb[0].mxu1 }
 0x1ec   :  { %v913_v63 = vadd.f32 %v899_v38, %v887_v57  ;;  %v987_v45 = vunpack.c.h.s8.bf16 %v2726_v55  ;;  %v903_v55 = vrot.slane %v2858_v37, %v2881_v40  ;;  %v986_v31 = vunpack.c.h.s8.bf16 %v936_v0  ;;  %v859_v26 = vpop.f32.mrb[1].mxu1 }
 0x1ed   :  { %v916_v32 = vmax.f32 %v912_v58, 0.0  ;;  %v888_v25 = vmul.f32 %v877_v20, %v857_v59  ;;  %v989_v17 = vunpack.c.l.s8.bf16 %v939_v50  ;;  %v889_v18 = vmul.f32 %v881_v19, %v859_v26  ;;  %v861_v14 = vpop.f32.mrb[2].mxu1  ;;  %1525 = vmatprep.subr.bf16.mxu1 %v1957_v51 }
 0x1ee   :  { %v917_v2 = vmax.f32 %v913_v63, 0.0  ;;  %v1961_v38 = vcombine.high %v1178_v11, %v1180_v12  ;;  %v862_v58 = vpop.f32.mrb[3].mxu1  ;;  %v1182_v63 = vunpack.c.h.s8.bf16 %v2779_v23  ;;  %v1184_v37 = vunpack.c.h.s8.bf16 %v2781_v24 }
 0x1ef   :  { %v1016_v49 = vpack.c.bf16 %v916_v32, %v916_v32  ;;  %v1956_v32 = vcombine.low %v1174_v44, %v1176_v56  ;;  %v2898_v57 = vadd.f32 %v903_v55, %v888_v25  ;;  %v915_v5 = vadd.f32 %v907_v60, %v889_v18  ;;  %v943_v60 = vld [vmem:[#allocation7 + $0xb8] sm:$0xff]  ;;  %v942_v25 = vld [vmem:[#allocation7 + $0xb0] sm:$0xff]  ;;  %v945_v58 = vld [vmem:[#allocation7 + $0xc8] sm:$0xff] }
 0x1f0   :  { %v1017_v1 = vpack.c.bf16 %v917_v2, %v917_v2  ;;  %v988_v0 = vunpack.c.l.s8.bf16 %v938_v13  ;;  %v1960_v6 = vcombine.low %v1178_v11, %v1180_v12  ;;  %v991_v44 = vunpack.c.h.s8.bf16 %v939_v50 }
 0x1f1   :  { %1526 = vmatpush1.bf16.msra.mxu1 %v1956_v32  ;;  %v919_v56 = vmax.f32 %v915_v5, 0.0  ;;  %v1186_v2 = vunpack.c.h.s8.bf16 %v2789_v29  ;;  %v990_v23 = vunpack.c.h.s8.bf16 %v938_v13  ;;  %v1964_v24 = vcombine.low %v1182_v63, %v1184_v37 }
 0x1f2   :  { %1052 = vmatprep.mubr.bf16.mxu0 %v1017_v1  ;;  %1527 = vmatprep.subr.bf16.mxu1 %v1961_v38  ;;  %v1965_v1 = vcombine.high %v1182_v63, %v1184_v37  ;;  %v1190_v51 = vunpack.c.h.s8.bf16 %v2799_v35  ;;  %v1192_v11 = vunpack.c.h.s8.bf16 %v2801_v36  ;;  %v992_v29 = vunpack.c.l.s8.bf16 %v940_v52 }
 0x1f3   :  { %1053 = vmatmul.mubr.bf16.vlgmr.msra.gmra.mrb[4].mxu0 %v1016_v49  ;;  %v1019_v20 = vpack.c.bf16 %v919_v56, %v919_v56  ;;  %v1194_v55 = vunpack.c.h.s8.bf16 %v2809_v41  ;;  %v1196_v59 = vunpack.c.h.s8.bf16 %v2811_v42  ;;  %v997_v36 = vunpack.c.l.s8.bf16 %v943_v60  ;;  %v2914_v56 = vld [vmem:[#allocation11 + $0xc0] sm:$0xff] }
 0x1f4   :  { %1062 = vmatpush1.bf16.msra.mxu0 %v984_v46  ;;  %v1188_v46 = vunpack.c.h.s8.bf16 %v2791_v30  ;;  %v1973_v50 = vcombine.high %v1190_v51, %v1192_v11  ;;  %v1972_v35 = vcombine.low %v1190_v51, %v1192_v11  ;;  %v1198_v32 = vunpack.c.h.s8.bf16 %v2819_v47 }
 0x1f5   :  { %1063 = vmatprep.subr.bf16.mxu0 %v987_v45  ;;  %v941_v45 = vld [vmem:[#allocation7 + $0xa8] sm:$0xff]  ;;  %1528 = vmatpush1.bf16.msra.mxu1 %v1960_v6  ;;  %v1977_v26 = vcombine.high %v1194_v55, %v1196_v59  ;;  %v996_v13 = vunpack.c.l.s8.bf16 %v942_v25  ;;  %v1976_v41 = vcombine.low %v1194_v55, %v1196_v59  ;;  %v999_v42 = vunpack.c.h.s8.bf16 %v943_v60  ;;  %v948_v60 = vld [vmem:[#allocation7 + $0xe0] sm:$0xff] }
 0x1f6   :  { %v993_v19 = vunpack.c.l.s8.bf16 %v941_v45  ;;  %1093 = vmatprep.mubr.bf16.mxu0 %v1019_v20  ;;  %v1969_v49 = vcombine.high %v1186_v2, %v1188_v46  ;;  %1529 = vmatprep.subr.bf16.mxu1 %v1965_v1  ;;  %v1968_v30 = vcombine.low %v1186_v2, %v1188_v46  ;;  %v995_v12 = vunpack.c.h.s8.bf16 %v941_v45  ;;  %v947_v45 = vld [vmem:[#allocation7 + $0xd8] sm:$0xff] }
 0x1f7   :  { %v1202_v14 = vunpack.c.h.s8.bf16 %v2829_v53  ;;  %v1204_v38 = vunpack.c.h.s8.bf16 %v2831_v54  ;;  %v998_v63 = vunpack.c.h.s8.bf16 %v942_v25  ;;  %v1001_v47 = vunpack.c.l.s8.bf16 %v945_v58  ;;  %v951_v25 = vld [vmem:[#allocation7 + $0xf8] sm:$0xff] }
 0x1f8   :  { %1064 = vmatpush1.bf16.msra.mxu0 %v986_v31  ;;  %v994_v31 = vunpack.c.h.s8.bf16 %v940_v52  ;;  %v1208_v6 = vunpack.c.h.s8.bf16 %v2841_v8  ;;  %v1003_v54 = vunpack.c.h.s8.bf16 %v945_v58  ;;  %v1210_v46 = vunpack.c.h.s8.bf16 %v2914_v56  ;;  %v946_v8 = vld [vmem:[#allocation7 + $0xd0] sm:$0xff] }
 0x1f9   :  { %1065 = vmatprep.subr.bf16.mxu0 %v989_v17  ;;  %1530 = vmatpush1.bf16.msra.mxu1 %v1964_v24  ;;  %v1200_v17 = vunpack.c.h.s8.bf16 %v2821_v48  ;;  %v944_v48 = vld [vmem:[#allocation7 + $0xc0] sm:$0xff]  ;;  %v1985_v5 = vcombine.high %v1202_v14, %v1204_v38  ;;  %v1984_v53 = vcombine.low %v1202_v14, %v1204_v38  ;;  %v1004_v52 = vunpack.c.l.s8.bf16 %v946_v8  ;;  %v1619_v38 = vld [vmem:[#allocation16 + $0x18] sm:$0xff] }
 0x1fa   :  { %1531 = vmatprep.subr.bf16.mxu1 %v1969_v49  ;;  %v1002_v1 = vunpack.c.h.s8.bf16 %v944_v48  ;;  %v1992_v24 = vcombine.low %v1210_v46, %v1210_v46  ;;  %v1007_v49 = vunpack.c.h.s8.bf16 %v947_v45  ;;  %v1653_v58 = vunpack.c.l.s8.bf16 %v1619_v38 }
 0x1fb   :  { %v1981_v18 = vcombine.high %v1198_v32, %v1200_v17  ;;  %v1980_v37 = vcombine.low %v1198_v32, %v1200_v17  ;;  %v1013_v32 = vunpack.c.l.s8.bf16 %v951_v25  ;;  %v950_v17 = vld [vmem:[#allocation7 + $0xf0] sm:$0xff] }
 0x1fc   :  { %1066 = vmatpush1.bf16.msra.mxu0 %v988_v0  ;;  %v1206_v0 = vunpack.c.h.s8.bf16 %v2839_v7  ;;  %v1005_v7 = vunpack.c.l.s8.bf16 %v947_v45  ;;  %v1473_v51 = vsel %vm1465_vm3, %v1992_v24, 0 }
 0x1fd   :  { %1067 = vmatprep.subr.bf16.mxu0 %v991_v44  ;;  %1532 = vmatpush1.bf16.msra.mxu1 %v1968_v30  ;;  %v1000_v44 = vunpack.c.l.s8.bf16 %v944_v48  ;;  %v949_v30 = vld [vmem:[#allocation7 + $0xe8] sm:$0xff]  ;;  %v1621_v48 = vld [vmem:[#allocation16 + $0x28] sm:$0xff] }
 0x1fe   :  { %1533 = vmatprep.subr.bf16.mxu1 %v1973_v50  ;;  %v1989_v2 = vcombine.high %v1206_v0, %v1208_v6  ;;  %v1988_v20 = vcombine.low %v1206_v0, %v1208_v6  ;;  %v1006_v50 = vunpack.c.h.s8.bf16 %v946_v8  ;;  %v1009_v59 = vunpack.c.l.s8.bf16 %v949_v30  ;;  %v1620_v6 = vld [vmem:[#allocation16 + $0x20] sm:$0xff] }
 0x1ff   :  { %v1657_v0 = vunpack.c.l.s8.bf16 %v1621_v48 }
 0x200   :  { %1068 = vmatpush1.bf16.msra.mxu0 %v990_v23  ;;  %v1993_v23 = vcombine.high %v1210_v46, %v1210_v46  ;;  %v1622_v46 = vld [vmem:[#allocation16 + $0x30] sm:$0xff] }
 0x201   :  { %1069 = vmatprep.subr.bf16.mxu0 %v993_v19  ;;  %1534 = vmatpush1.bf16.msra.mxu1 %v1972_v35  ;;  %v2917_v19 = vld [vmem:[#allocation16 + $0x8] sm:$0xff]  ;;  %v1008_v35 = vunpack.c.l.s8.bf16 %v948_v60  ;;  %v1660_v45 = vunpack.c.l.s8.bf16 %v1622_v46 }
 0x202   :  { %1535 = vmatprep.subr.bf16.mxu1 %v1977_v26  ;;  %v1649_v11 = vunpack.c.l.s8.bf16 %v2917_v19  ;;  %v1010_v26 = vunpack.c.h.s8.bf16 %v948_v60 }
 0x204   :  { %1070 = vmatpush1.bf16.msra.mxu0 %v992_v29  ;;  %v2922_v29 = vld [vmem:[#allocation16] sm:$0xff] }
 0x205   :  { %1071 = vmatprep.subr.bf16.mxu0 %v995_v12  ;;  %1536 = vmatpush1.bf16.msra.mxu1 %v1976_v41  ;;  %v1132_v12 = vld [vmem:[%s3004_s1] sm:$0xff]  ;;  %v1648_v55 = vunpack.c.l.s8.bf16 %v2922_v29  ;;  %v1015_v41 = vunpack.c.h.s8.bf16 %v951_v25  ;;  %s2350_s1 = smov [#allocation20]  }
 0x206   :  { %1537 = vmatprep.subr.bf16.mxu1 %v1981_v18  ;;  %v918_v18 = vmax.f32 %v2898_v57, 0.0  ;;  %v1650_v57 = vunpack.c.h.s8.bf16 %v2922_v29  ;;  %s1834_s16 = sshll.u32 %s2350_s1, 4  ;;  %s1835_s16 = int_to_ptr.vmem [resolvable:$true] %s1834_s16 }
 0x207   :  { %s2274_s30 = scalar_lea.vmem %s1835_s16, 256  ;;  %p2279_p5 = scmp.lt.s32.totalorder %s1835_s16, %s1835_s16 }
 0x208   :  { %1072 = vmatpush1.bf16.msra.mxu0 %v994_v31  ;;  %v1134_v31 = vpack.c.bf16 %v1132_v12, %v1132_v12  ;;  %v1018_v14 = vpack.c.bf16 %v918_v18, %v918_v18  ;;  %v1629_v12 = vld [vmem:[#allocation16 + $0x68] sm:$0xff]  ;;  %v1560_v18 = vld [vmem:[#allocation13] sm:$0xf]  ;;  %p2275_p4 = scmp.ne.s32.totalorder %s1835_s16, %s2274_s30  ;;  %p2280_p6 = scmp.lt.s32.totalorder %s2274_s30, %s2274_s30 }
 0x209   :  { %1073 = vmatprep.subr.bf16.mxu0 %v997_v36  ;;  %1538 = vmatpush1.bf16.msra.mxu1 %v1980_v37  ;;  %v1011_v36 = vunpack.c.h.s8.bf16 %v949_v30 }
 0x20a   :  { %1539 = vmatprep.subr.bf16.mxu1 %v1985_v5  ;;  %p2281_p7 = por %p2280_p6, %p2279_p5 }
 0x20c   :  { %1074 = vmatpush1.bf16.msra.mxu0 %v996_v13  ;;  %v1012_v13 = vunpack.c.l.s8.bf16 %v950_v17  ;;  %p2282_p8 = pnand %p2281_p7, %p2275_p4 }
 0x20d   :  { %1075 = vmatprep.subr.bf16.mxu0 %v999_v42  ;;  %1540 = vmatpush1.bf16.msra.mxu1 %v1984_v53  ;;  %v1014_v42 = vunpack.c.h.s8.bf16 %v950_v17  ;;  %v1623_v53 = vld [vmem:[#allocation16 + $0x38] sm:$0xff] }
 0x20e   :  { %1541 = vmatprep.subr.bf16.mxu1 %v1989_v2  ;;  %v1661_v2 = vunpack.c.l.s8.bf16 %v1623_v53 }
 0x210   :  { %1076 = vmatpush1.bf16.msra.mxu0 %v998_v63  ;;  %v1618_v63 = vld [vmem:[#allocation16 + $0x10] sm:$0xff] }
 0x211   :  { %1077 = vmatprep.subr.bf16.mxu0 %v1001_v47  ;;  %1542 = vmatpush1.bf16.msra.mxu1 %v1988_v20  ;;  %v1652_v37 = vunpack.c.l.s8.bf16 %v1618_v63  ;;  %v1655_v47 = vunpack.c.h.s8.bf16 %v1619_v38  ;;  %v1654_v5 = vunpack.c.h.s8.bf16 %v1618_v63  ;;  %v1625_v20 = vld [vmem:[#allocation16 + $0x48] sm:$0xff] }
 0x212   :  { %1996 = vmatprep.subr.msk.bf16.mxu1 %vm1465_vm3, %v1993_v23  ;;  %v1665_v8 = vunpack.c.l.s8.bf16 %v1625_v20  ;;  %v1624_v23 = vld [vmem:[#allocation16 + $0x40] sm:$0xff] }
 0x213   :  { %v1664_v24 = vunpack.c.l.s8.bf16 %v1624_v23 }
 0x214   :  { %1078 = vmatpush1.bf16.msra.mxu0 %v1000_v44  ;;  %v1656_v44 = vunpack.c.l.s8.bf16 %v1620_v6 }
 0x215   :  { %1079 = vmatprep.subr.bf16.mxu0 %v1003_v54  ;;  %1544 = vmatpush1.bf16.msra.mxu1 %v1473_v51  ;;  %v1658_v54 = vunpack.c.h.s8.bf16 %v1620_v6 }
 0x216   :  { %1716 = vmatprep.subr.bf16.mxu1 %v1649_v11  ;;  %v1626_v11 = vld [vmem:[#allocation16 + $0x50] sm:$0xff] }
 0x217   :  { %v1668_v29 = vunpack.c.l.s8.bf16 %v1626_v11 }
 0x218   :  { %1080 = vmatpush1.bf16.msra.mxu0 %v1002_v1  ;;  %1552 = vmatmul.mubr.bf16.vlgmr.msra.gmra.mrb[4].mxu1 %v1134_v31  ;;  %v1663_v1 = vunpack.c.h.s8.bf16 %v1623_v53 }
 0x219   :  { %1081 = vmatprep.subr.bf16.mxu0 %v1005_v7  ;;  %1717 = vmatpush1.bf16.msra.mxu1 %v1648_v55  ;;  %v1662_v7 = vunpack.c.h.s8.bf16 %v1622_v46  ;;  %v1673_v55 = vunpack.c.l.s8.bf16 %v1629_v12 }
 0x21c   :  { %1082 = vmatpush1.bf16.msra.mxu0 %v1004_v52  ;;  %v1627_v52 = vld [vmem:[#allocation16 + $0x58] sm:$0xff] }
 0x21d   :  { %1083 = vmatprep.subr.bf16.mxu0 %v1007_v49  ;;  %v1666_v49 = vunpack.c.h.s8.bf16 %v1624_v23  ;;  %v1669_v51 = vunpack.c.l.s8.bf16 %v1627_v52  ;;  %v1671_v30 = vunpack.c.h.s8.bf16 %v1627_v52 }
 0x220   :  { %1084 = vmatpush1.bf16.msra.mxu0 %v1006_v50  ;;  %v1670_v50 = vunpack.c.h.s8.bf16 %v1626_v11 }
 0x221   :  { %1085 = vmatprep.subr.bf16.mxu0 %v1009_v59  ;;  %v1628_v59 = vld [vmem:[#allocation16 + $0x60] sm:$0xff] }
 0x222   :  { %v1672_v60 = vunpack.c.l.s8.bf16 %v1628_v59 }
 0x224   :  { %1086 = vmatpush1.bf16.msra.mxu0 %v1008_v35  ;;  %v1674_v35 = vunpack.c.h.s8.bf16 %v1628_v59 }
 0x225   :  { %1087 = vmatprep.subr.bf16.mxu0 %v1011_v36  ;;  %v1631_v36 = vld [vmem:[#allocation16 + $0x78] sm:$0xff] }
 0x226   :  { %v1677_v25 = vunpack.c.l.s8.bf16 %v1631_v36  ;;  %v1679_v17 = vunpack.c.h.s8.bf16 %v1631_v36 }
 0x228   :  { %1088 = vmatpush1.bf16.msra.mxu0 %v1010_v26  ;;  %v1630_v26 = vld [vmem:[#allocation16 + $0x70] sm:$0xff] }
 0x229   :  { %1089 = vmatprep.subr.bf16.mxu0 %v1013_v32  ;;  %v1676_v32 = vunpack.c.l.s8.bf16 %v1630_v26 }
 0x22c   :  { %1090 = vmatpush1.bf16.msra.mxu0 %v1012_v13  ;;  %v1678_v13 = vunpack.c.h.s8.bf16 %v1630_v26 }
 0x22d   :  { %1091 = vmatprep.subr.bf16.mxu0 %v1015_v41  ;;  %v1633_v41 = vld [vmem:[#allocation16 + $0x88] sm:$0xff] }
 0x230   :  { %1092 = vmatpush1.bf16.msra.mxu0 %v1014_v42  ;;  %v1681_v42 = vunpack.c.l.s8.bf16 %v1633_v41 }
 0x231   :  { %1478 = vmatprep.subr.bf16.mxu0 %v2735_v61  ;;  %v3035_v61 = vld [vmem:[#allocation31_spill] sm:$0xff] }
 0x233   :  { %1094 = vmatmul.mubr.bf16.vlgmr.msra.gmra.mrb[4].mxu0 %v1018_v14  ;;  %v1586_v14 = vld [vmem:[#allocation14] sm:$0xf] }
 0x234   :  { %1479 = vmatpush1.bf16.msra.mxu0 %v2737_v62  ;;  %1995 = vmatprep.mubr.msk.bf16.mxu0 %vm1461_vm2, %v2863_v43  ;;  %v3036_v62 = vld [vmem:[#allocation32_spill] sm:$0xff]  ;;  %v1651_v43 = vunpack.c.h.s8.bf16 %v2917_v19  ;;  %v1667_v19 = vunpack.c.h.s8.bf16 %v1625_v20 }
 0x235   :  { %1480 = vmatprep.subr.bf16.mxu0 %v2745_v3  ;;  %v3037_v3 = vld [vmem:[#allocation33_spill] sm:$0xff] }
 0x236   :  { %1718 = vmatprep.subr.bf16.mxu1 %v1651_v43 }
 0x237   :  { %1719 = vmatpush1.bf16.msra.mxu1 %v1650_v57 }
 0x238   :  { %1481 = vmatpush1.bf16.msra.mxu0 %v2747_v4  ;;  %v3038_v4 = vld [vmem:[#allocation34_spill] sm:$0xff]  ;;  %1720 = vmatprep.subr.bf16.mxu1 %v1653_v58 }
 0x239   :  { %1482 = vmatprep.subr.bf16.mxu0 %v2755_v9  ;;  %v3039_v9 = vld [vmem:[#allocation35_spill] sm:$0xff] }
 0x23b   :  { %1721 = vmatpush1.bf16.msra.mxu1 %v1652_v37 }
 0x23c   :  { %1483 = vmatpush1.bf16.msra.mxu0 %v2757_v10  ;;  %v3040_v10 = vld [vmem:[#allocation36_spill] sm:$0xff]  ;;  %1722 = vmatprep.subr.bf16.mxu1 %v1655_v47 }
 0x23d   :  { %1484 = vmatprep.subr.bf16.mxu0 %v2765_v15  ;;  %v3041_v15 = vld [vmem:[#allocation37_spill] sm:$0xff] }
 0x23f   :  { %1723 = vmatpush1.bf16.msra.mxu1 %v1654_v5 }
 0x240   :  { %1485 = vmatpush1.bf16.msra.mxu0 %v2767_v16  ;;  %v1209_v16 = vunpack.c.l.s8.bf16 %v2914_v56  ;;  %1724 = vmatprep.subr.bf16.mxu1 %v1657_v0  ;;  %v1659_v56 = vunpack.c.h.s8.bf16 %v1621_v48  ;;  %v1577_v0 = vrot.slane %v1560_v18, %v2883_v39 }
 0x241   :  { %1486 = vmatprep.subr.bf16.mxu0 %v2775_v21  ;;  %v3042_v21 = vld [vmem:[#allocation38_spill] sm:$0xff] }
 0x243   :  { %1725 = vmatpush1.bf16.msra.mxu1 %v1656_v44  ;;  %v1603_v44 = vrot.slane %v1586_v14, %v2883_v39  ;;  %v1632_v39 = vld [vmem:[#allocation16 + $0x80] sm:$0xff] }
 0x244   :  { %1487 = vmatpush1.bf16.msra.mxu0 %v2777_v22  ;;  %v3043_v22 = vld [vmem:[#allocation39_spill] sm:$0xff]  ;;  %1726 = vmatprep.subr.bf16.mxu1 %v1659_v56  ;;  %v1682_v59 = vunpack.c.h.s8.bf16 %v1632_v39 }
 0x245   :  { %1488 = vmatprep.subr.bf16.mxu0 %v2785_v27  ;;  %v1991_v27 = vcombine.high %v1209_v16, %v1209_v16 }
 0x247   :  { %1727 = vmatpush1.bf16.msra.mxu1 %v1658_v54 }
 0x248   :  { %1489 = vmatpush1.bf16.msra.mxu0 %v2787_v28  ;;  %v1990_v28 = vcombine.low %v1209_v16, %v1209_v16  ;;  %1728 = vmatprep.subr.bf16.mxu1 %v1661_v2 }
 0x249   :  { %1490 = vmatprep.subr.bf16.mxu0 %v2795_v33  ;;  %v3044_v33 = vld [vmem:[#allocation40_spill] sm:$0xff] }
 0x24b   :  { %1729 = vmatpush1.bf16.msra.mxu1 %v1660_v45 }
 0x24c   :  { %1491 = vmatpush1.bf16.msra.mxu0 %v2797_v34  ;;  %v1467_v34 = vsel %vm1465_vm3, %v1990_v28, 0  ;;  %1730 = vmatprep.subr.bf16.mxu1 %v1663_v1 }
 0x24d   :  { %1492 = vmatprep.subr.bf16.mxu0 %v3035_v61 }
 0x24f   :  { %1731 = vmatpush1.bf16.msra.mxu1 %v1662_v7 }
 0x250   :  { %1493 = vmatpush1.bf16.msra.mxu0 %v3036_v62  ;;  %1732 = vmatprep.subr.bf16.mxu1 %v1665_v8  ;;  %v1573_v62 = vrot.slane %v1560_v18, %v2881_v40 }
 0x251   :  { %1494 = vmatprep.subr.bf16.mxu0 %v3037_v3  ;;  %v1599_v3 = vrot.slane %v1586_v14, %v2881_v40 }
 0x253   :  { %1733 = vmatpush1.bf16.msra.mxu1 %v1664_v24 }
 0x254   :  { %1495 = vmatpush1.bf16.msra.mxu0 %v3038_v4  ;;  %1734 = vmatprep.subr.bf16.mxu1 %v1667_v19 }
 0x255   :  { %1496 = vmatprep.subr.bf16.mxu0 %v3039_v9 }
 0x257   :  { %1735 = vmatpush1.bf16.msra.mxu1 %v1666_v49 }
 0x258   :  { %1497 = vmatpush1.bf16.msra.mxu0 %v3040_v10  ;;  %1736 = vmatprep.subr.bf16.mxu1 %v1669_v51 }
 0x259   :  { %1498 = vmatprep.subr.bf16.mxu0 %v3041_v15 }
 0x25b   :  { %1737 = vmatpush1.bf16.msra.mxu1 %v1668_v29  ;;  %v1680_v29 = vunpack.c.l.s8.bf16 %v1632_v39 }
 0x25c   :  { %1499 = vmatpush1.bf16.msra.mxu0 %v3042_v21  ;;  %1738 = vmatprep.subr.bf16.mxu1 %v1671_v30  ;;  %v1102_v21 = vld [vmem:[#allocation8] sm:$0x3] }
 0x25d   :  { %1500 = vmatprep.subr.bf16.mxu0 %v3043_v22  ;;  %v1116_v22 = vld [vmem:[#allocation10] sm:$0x3] }
 0x25f   :  { %1739 = vmatpush1.bf16.msra.mxu1 %v1670_v50  ;;  %v1683_v50 = vunpack.c.h.s8.bf16 %v1633_v41 }
 0x260   :  { %1501 = vmatpush1.bf16.msra.mxu0 %v3044_v33  ;;  %1740 = vmatprep.subr.bf16.mxu1 %v1673_v55  ;;  %v3046_v33 = vld [vmem:[#allocation42_spill] sm:$0xff] }
 0x261   :  { %1994 = vmatprep.subr.msk.bf16.mxu0 %vm1465_vm3, %v1991_v27  ;;  %v3045_v27 = vld [vmem:[#allocation41_spill] sm:$0xff]  ;;  %v1125_v38 = vrot.slane %v1116_v22, %v3046_v33  ;;  %v1569_v53 = vrot.slane %v1560_v18, %v3046_v33  ;;  %v1595_v46 = vrot.slane %v1586_v14, %v3046_v33 }
 0x262   :  { %v1107_v28 = vrot.slane %v1102_v21, %v3045_v27  ;;  %v1121_v43 = vrot.slane %v1116_v22, %v3045_v27  ;;  %v1565_v56 = vrot.slane %v1560_v18, %v3045_v27  ;;  %v1591_v54 = vrot.slane %v1586_v14, %v3045_v27  ;;  %v1635_v55 = vld [vmem:[#allocation16 + $0x98] sm:$0xff] }
 0x263   :  { %1741 = vmatpush1.bf16.msra.mxu1 %v1672_v60  ;;  %v1685_v60 = vunpack.c.l.s8.bf16 %v1635_v55  ;;  %v1687_v36 = vunpack.c.h.s8.bf16 %v1635_v55 }
 0x264   :  { %1503 = vmatpush1.bf16.msra.mxu0 %v1467_v34  ;;  %v1111_v34 = vrot.slane %v1102_v21, %v3046_v33 }
 0x267   :  { %1511 = vmatmul.mubr.bf16.vlgmr.msra.gmra.mrb[8].mxu0 %v1134_v31  ;;  %v1675_v31 = vunpack.c.h.s8.bf16 %v1629_v12 }
 0x269   :  { %1742 = vmatprep.subr.bf16.mxu1 %v1675_v31  ;;  %v1634_v31 = vld [vmem:[#allocation16 + $0x90] sm:$0xff] }
 0x26a   :  { %1743 = vmatpush1.bf16.msra.mxu1 %v1674_v35  ;;  %v1684_v35 = vunpack.c.l.s8.bf16 %v1634_v31  ;;  %v1686_v26 = vunpack.c.h.s8.bf16 %v1634_v31 }
 0x26b   :  { %1744 = vmatprep.subr.bf16.mxu1 %v1677_v25  ;;  %v1637_v25 = vld [vmem:[#allocation16 + $0xa8] sm:$0xff] }
 0x26c   :  { %v1691_v41 = vunpack.c.h.s8.bf16 %v1637_v25 }
 0x26e   :  { %1745 = vmatpush1.bf16.msra.mxu1 %v1676_v32  ;;  %v1689_v32 = vunpack.c.l.s8.bf16 %v1637_v25 }
 0x26f   :  { %1746 = vmatprep.subr.bf16.mxu1 %v1679_v17  ;;  %v1636_v17 = vld [vmem:[#allocation16 + $0xa0] sm:$0xff] }
 0x270   :  { %v1690_v18 = vunpack.c.h.s8.bf16 %v1636_v17 }
 0x272   :  { %1747 = vmatpush1.bf16.msra.mxu1 %v1678_v13  ;;  %v1688_v13 = vunpack.c.l.s8.bf16 %v1636_v17 }
 0x273   :  { %1757 = vmatprep.subr.bf16.mxu1 %v1681_v42  ;;  %v1639_v42 = vld [vmem:[#allocation16 + $0xb8] sm:$0xff] }
 0x274   :  { %v1693_v14 = vunpack.c.l.s8.bf16 %v1639_v42 }
 0x2eb   :  { %v1553_v61 = vpop.f32.mrb[4].mxu1 }
 0x2ec   :  { %v1555_v4 = vpop.f32.mrb[5].mxu1  ;;  %v1584_v9 = vmul.f32 %v1573_v62, %v1553_v61  ;;  %v1638_v61 = vld [vmem:[#allocation16 + $0xb0] sm:$0xff] }
 0x2ed   :  { %v1557_v10 = vpop.f32.mrb[6].mxu1  ;;  %v1585_v6 = vmul.f32 %v1577_v0, %v1555_v4  ;;  %v1692_v62 = vunpack.c.l.s8.bf16 %v1638_v61  ;;  %v1641_v4 = vld [vmem:[#allocation16 + $0xc8] sm:$0xff]  ;;  %v1647_v0 = vld [vmem:[#allocation16 + $0xf8] sm:$0xff] }
 0x2ee   :  { %v1558_v15 = vpop.f32.mrb[7].mxu1  ;;  %v2962_v16 = vadd.f32 %v1599_v3, %v1584_v9  ;;  %v1695_v3 = vunpack.c.h.s8.bf16 %v1639_v42  ;;  %v1694_v9 = vunpack.c.h.s8.bf16 %v1638_v61  ;;  %v1697_v10 = vunpack.c.l.s8.bf16 %v1641_v4 }
 0x2ef   :  { %v1611_v45 = vadd.f32 %v1603_v44, %v1585_v6  ;;  %v1640_v15 = vld [vmem:[#allocation16 + $0xc0] sm:$0xff]  ;;  %v1699_v22 = vunpack.c.h.s8.bf16 %v1641_v4  ;;  %v1709_v44 = vunpack.c.l.s8.bf16 %v1647_v0 }
 0x2f0   :  { %v1696_v21 = vunpack.c.l.s8.bf16 %v1640_v15 }
 0x2f1   :  { %v1615_v52 = vmax.f32 %v1611_v45, 0.0 }
 0x2f3   :  { %v1715_v30 = vpack.c.bf16 %v1615_v52, %v1615_v52 }
 0x306   :  { %v1095_v57 = vpop.f32.mrb[4].mxu0 }
 0x307   :  { %v1114_v58 = vmul.f32 %v1107_v28, %v1095_v57  ;;  %v1097_v63 = vpop.f32.mrb[5].mxu0  ;;  %v1643_v28 = vld [vmem:[#allocation16 + $0xd8] sm:$0xff]  ;;  %v1642_v57 = vld [vmem:[#allocation16 + $0xd0] sm:$0xff] }
 0x308   :  { %v1115_v40 = vmul.f32 %v1111_v34, %v1097_v63  ;;  %v1099_v37 = vpop.f32.mrb[6].mxu0  ;;  %v1698_v34 = vunpack.c.h.s8.bf16 %v1640_v15  ;;  %v1645_v63 = vld [vmem:[#allocation16 + $0xe8] sm:$0xff] }
 0x309   :  { %v1128_v47 = vadd.f32 %v1121_v43, %v1114_v58  ;;  %v1100_v48 = vpop.f32.mrb[7].mxu0  ;;  %v1701_v43 = vunpack.c.l.s8.bf16 %v1643_v28  ;;  %v1703_v58 = vunpack.c.h.s8.bf16 %v1643_v28  ;;  %v1705_v37 = vunpack.c.l.s8.bf16 %v1645_v63 }
 0x30a   :  { %v1129_v5 = vadd.f32 %v1125_v38, %v1115_v40  ;;  %v1700_v38 = vunpack.c.l.s8.bf16 %v1642_v57  ;;  %v1702_v40 = vunpack.c.h.s8.bf16 %v1642_v57 }
 0x30b   :  { %1130 = vst [vmem:[#allocation20] sm:$0xff] %v1128_v47  ;;  %v1644_v47 = vld [vmem:[#allocation16 + $0xe0] sm:$0xff] }
 0x30c   :  { %1131 = vst [vmem:[#allocation20 + $0x8] sm:$0xff] %v1129_v5  ;;  %v1704_v48 = vunpack.c.l.s8.bf16 %v1644_v47  ;;  %v1707_v5 = vunpack.c.h.s8.bf16 %v1645_v63  ;;  %v1706_v6 = vunpack.c.h.s8.bf16 %v1644_v47 }
 0x33a   :  { %v1512_v2 = vpop.f32.mrb[8].mxu0 }
 0x33b   :  { %v1582_v1 = vmul.f32 %v1565_v56, %v1512_v2  ;;  %v1514_v20 = vpop.f32.mrb[9].mxu0  ;;  %v1646_v56 = vld [vmem:[#allocation16 + $0xf0] sm:$0xff] }
 0x33c   :  { %v1583_v7 = vmul.f32 %v1569_v53, %v1514_v20  ;;  %v1516_v8 = vpop.f32.mrb[10].mxu0  ;;  %v1708_v53 = vunpack.c.l.s8.bf16 %v1646_v56  ;;  %v1710_v2 = vunpack.c.h.s8.bf16 %v1646_v56 }
 0x33d   :  { %v1608_v23 = vadd.f32 %v1591_v54, %v1582_v1  ;;  %v1517_v24 = vpop.f32.mrb[11].mxu0  ;;  %v1711_v54 = vunpack.c.h.s8.bf16 %v1647_v0 }
 0x33e   :  { %v1609_v19 = vadd.f32 %v1595_v46, %v1583_v7  ;;  %v1614_v46 = vmax.f32 %v2962_v16, 0.0 }
 0x33f   :  { %v1612_v49 = vmax.f32 %v1608_v23, 0.0 }
 0x340   :  { %v1613_v51 = vmax.f32 %v1609_v19, 0.0  ;;  %v1714_v45 = vpack.c.bf16 %v1614_v46, %v1614_v46 }
 0x341   :  { %v1712_v12 = vpack.c.bf16 %v1612_v49, %v1612_v49 }
 0x342   :  { %v1713_v11 = vpack.c.bf16 %v1613_v51, %v1613_v51 }
 0x344   :  { %1748 = vmatprep.mubr.bf16.mxu1 %v1713_v11 }
 0x345   :  { %1749 = vmatmul.mubr.bf16.vlgmr.msra.gmra.mrb[8].mxu1 %v1712_v12 }
 0x346   :  { %1758 = vmatpush1.bf16.msra.mxu1 %v1680_v29  ;;  %1789 = vmatprep.mubr.bf16.mxu1 %v1715_v30 }
 0x347   :  { %1759 = vmatprep.subr.bf16.mxu1 %v1683_v50 }
 0x34a   :  { %1760 = vmatpush1.bf16.msra.mxu1 %v1682_v59 }
 0x34b   :  { %1761 = vmatprep.subr.bf16.mxu1 %v1685_v60 }
 0x34e   :  { %1762 = vmatpush1.bf16.msra.mxu1 %v1684_v35 }
 0x34f   :  { %1763 = vmatprep.subr.bf16.mxu1 %v1687_v36 }
 0x352   :  { %1764 = vmatpush1.bf16.msra.mxu1 %v1686_v26 }
 0x353   :  { %1765 = vmatprep.subr.bf16.mxu1 %v1689_v32 }
 0x356   :  { %1766 = vmatpush1.bf16.msra.mxu1 %v1688_v13 }
 0x357   :  { %1767 = vmatprep.subr.bf16.mxu1 %v1691_v41 }
 0x35a   :  { %1768 = vmatpush1.bf16.msra.mxu1 %v1690_v18 }
 0x35b   :  { %1769 = vmatprep.subr.bf16.mxu1 %v1693_v14 }
 0x35e   :  { %1770 = vmatpush1.bf16.msra.mxu1 %v1692_v62 }
 0x35f   :  { %1771 = vmatprep.subr.bf16.mxu1 %v1695_v3 }
 0x362   :  { %1772 = vmatpush1.bf16.msra.mxu1 %v1694_v9 }
 0x363   :  { %1773 = vmatprep.subr.bf16.mxu1 %v1697_v10 }
 0x366   :  { %1774 = vmatpush1.bf16.msra.mxu1 %v1696_v21 }
 0x367   :  { %1775 = vmatprep.subr.bf16.mxu1 %v1699_v22 }
 0x36a   :  { %1776 = vmatpush1.bf16.msra.mxu1 %v1698_v34 }
 0x36b   :  { %1777 = vmatprep.subr.bf16.mxu1 %v1701_v43 }
 0x36e   :  { %1778 = vmatpush1.bf16.msra.mxu1 %v1700_v38 }
 0x36f   :  { %1779 = vmatprep.subr.bf16.mxu1 %v1703_v58 }
 0x372   :  { %1780 = vmatpush1.bf16.msra.mxu1 %v1702_v40 }
 0x373   :  { %1781 = vmatprep.subr.bf16.mxu1 %v1705_v37 }
 0x376   :  { %1782 = vmatpush1.bf16.msra.mxu1 %v1704_v48 }
 0x377   :  { %1783 = vmatprep.subr.bf16.mxu1 %v1707_v5 }
 0x37a   :  { %1784 = vmatpush1.bf16.msra.mxu1 %v1706_v6 }
 0x37b   :  { %1785 = vmatprep.subr.bf16.mxu1 %v1709_v44 }
 0x37e   :  { %1786 = vmatpush1.bf16.msra.mxu1 %v1708_v53 }
 0x37f   :  { %1787 = vmatprep.subr.bf16.mxu1 %v1711_v54 }
 0x382   :  { %1788 = vmatpush1.bf16.msra.mxu1 %v1710_v2 }
 0x385   :  { %1790 = vmatmul.mubr.bf16.vlgmr.msra.gmra.mrb[8].mxu1 %v1714_v45 }
 0x386   :  { %2285 = shalt.err (!%p2282_p8)
}
 0x387   :  { %s2286_s19 = scalar_lea.hbm %s3017_s14, 256 }
 0x388   :  { %p2287_p9 = scmp.ne.s32.totalorder %s3017_s14, %s2286_s19  ;;  %p2290_p10 = scmp.lt.u32.totalorder %s2286_s19, %s3017_s14 }
 0x38a   :  { %p2292_p11 = pnand %p2290_p10, %p2287_p9 }
 0x38c   :  { %2295 = shalt.err (!%p2292_p11)
}
 0x38d   :  { %1837 = dma.vmem_to_hbm [thread:$0]  %s1835_s16, 256, %s3017_s14, [#allocation4]   ;;  %v1798_v16 = vld [vmem:[#allocation17] sm:$0x3]  ;;  %v1812_v1 = vld [vmem:[#allocation19] sm:$0x3] }
 0x38e   :  { %v1803_v20 = vrot.slane %v1798_v16, %v3045_v27  ;;  %v1807_v7 = vrot.slane %v1798_v16, %v3046_v33  ;;  %v1817_v8 = vrot.slane %v1812_v1, %v3045_v27  ;;  %v1821_v24 = vrot.slane %v1812_v1, %v3046_v33  ;;  %s2351_s4 = smov [#allocation21]  }
 0x38f   :  { %s1844_s7 = sshll.u32 %s2351_s4, 4  ;;  %s1845_s7 = int_to_ptr.vmem [resolvable:$true] %s1844_s7 }
 0x390   :  { %s2296_s14 = scalar_lea.vmem %s1845_s7, 256  ;;  %p2301_p13 = scmp.lt.s32.totalorder %s1845_s7, %s1845_s7 }
 0x391   :  { %p2297_p12 = scmp.ne.s32.totalorder %s1845_s7, %s2296_s14  ;;  %p2302_p0 = scmp.lt.s32.totalorder %s2296_s14, %s2296_s14 }
 0x393   :  { %p2303_p1 = por %p2302_p0, %p2301_p13 }
 0x395   :  { %p2304_p2 = pnand %p2303_p1, %p2297_p12 }
 0x458   :  { %v1791_v23 = vpop.f32.mrb[8].mxu1 }
 0x459   :  { %v1810_v19 = vmul.f32 %v1803_v20, %v1791_v23  ;;  %v1793_v52 = vpop.f32.mrb[9].mxu1 }
 0x45a   :  { %v1811_v49 = vmul.f32 %v1807_v7, %v1793_v52  ;;  %v1795_v39 = vpop.f32.mrb[10].mxu1 }
 0x45b   :  { %v1824_v51 = vadd.f32 %v1817_v8, %v1810_v19  ;;  %v1796_v11 = vpop.f32.mrb[11].mxu1 }
 0x45c   :  { %v1825_v29 = vadd.f32 %v1821_v24, %v1811_v49 }
 0x45d   :  { %1826 = vst [vmem:[#allocation21] sm:$0xff] %v1824_v51 }
 0x45e   :  { %1827 = vst [vmem:[#allocation21 + $0x8] sm:$0xff] %v1825_v29 }
 0x45f   :  { %2307 = shalt.err (!%p2304_p2)
}
 0x460   :  { %s2308_s2 = scalar_lea.hbm %s3018_s15, 256 }
 0x461   :  { %p2309_p3 = scmp.ne.s32.totalorder %s3018_s15, %s2308_s2  ;;  %p2312_p4 = scmp.lt.u32.totalorder %s2308_s2, %s3018_s15 }
 0x463   :  { %p2314_p5 = pnand %p2312_p4, %p2309_p3 }
 0x465   :  { %2317 = shalt.err (!%p2314_p5)
}
 0x466   :  { %1847 = dma.vmem_to_hbm [thread:$0]  %s1845_s7, 256, %s3018_s15, [#allocation22]  }
 0x467   :  { %2330 = dma.done.wait [#allocation4], 256  }
 0x468   :  { %2331 = vsyncadd [#allocation4], 4294967040 }
 0x469   :  { %2332 = dma.done.wait [#allocation22], 256  }
 0x46a   :  { %2333 = vsyncadd [#allocation22], 4294967040 }
 0x46b   :  { %1854 = vsyncpa [#allocation3], 1 }
 0x46c   :  { %1855 = vsyncpa [#allocation6], 1 }
 0x46d   :  { %1856 = vsyncpa [#allocation9], 1 }
 0x46e   :  { %1857 = vsyncpa [#allocation12], 1 }
 0x46f   :  { %1858 = vsyncpa [#allocation15], 1 }
 0x470   :  { %1859 = vsyncpa [#allocation18], 1 }
 0x471   :  { %1860 = vsyncpa [#allocation4], 1 }
 0x472   :  { %1861 = vsyncpa [#allocation22], 1 }

</bundles_post_ra>
